<compile_context>
chip_gen: v5e
topology: v5e:2x2
jax: 0.10.0
libtpu: 0.0.40
codegen_flags: <defaults>
</compile_context>

<pallas_src>
import jax
import jax.numpy as jnp
from jax.experimental import pallas as pl
from jax.experimental.pallas import tpu as pltpu

KH = KW = 3          # conv kernel size
COUT_TILE = 128      # one MXU-lane-width tile of output channels per grid step


def relu_matmul_kernel(p_ref, w_ref, o_ref):
    """Fused ReLU + GEMM for one Cout tile.

    p_ref: [M, K]         bf16 im2col patches of the padded (un-ReLU'd) input
    w_ref: [K, COUT_TILE] bf16 weight tile (contiguous HBM read, double-buffered)
    o_ref: [M, COUT_TILE] f32  output tile (lane-dense, unmasked lane stores)
    """
    # ReLU on the VPU.  Padding zeros are unaffected; the 9x-duplicated patch
    # elements are free filler — the kernel is weight-DMA bound, VPU has slack.
    x = jnp.maximum(p_ref[...], 0.0)
    # Single long-K matmul on the MXU, f32 accumulation.
    o_ref[...] = jnp.dot(x, w_ref[...], preferred_element_type=jnp.float32)


def relu_conv2d(x_nchw, weight_oihw, *, cout_tile=COUT_TILE):
    """Forward pass of module M.

    x_nchw:      [N, Cin, H, W]      float32
    weight_oihw: [Cout, Cin, KH, KW] float32 (PyTorch Conv2d layout)
    returns:     [N, Cout, H, W]     float32
    """
    N, Cin, H, W = x_nchw.shape
    Cout = weight_oihw.shape[0]
    assert Cout % cout_tile == 0
    n_tiles = Cout // cout_tile

    # ---- layout plumbing in plain JAX: NCHW->NHWC, pad, im2col, bf16 cast ----
    x_nhwc = jnp.transpose(x_nchw, (0, 2, 3, 1)).astype(jnp.bfloat16)   # [N,H,W,Cin]
    x_pad = jnp.pad(x_nhwc, ((0, 0), (1, 1), (1, 1), (0, 0)))           # [N,H+2,W+2,Cin]
    # im2col; K axis ordered (kh, kw, cin) to match the weight reshape below.
    patches = jnp.concatenate(
        [x_pad[:, kh:kh + H, kw:kw + W, :] for kh in range(KH) for kw in range(KW)],
        axis=-1,
    ).reshape(N * H * W, KH * KW * Cin)                                  # [M, K]

    M_rows = N * H * W
    K = KH * KW * Cin

    # Weights: OIHW -> [K, Cout] (matching the patch K ordering), then split
    # into Cout tiles laid out contiguously in HBM: [n_tiles, K, cout_tile].
    w = jnp.transpose(weight_oihw, (2, 3, 1, 0)).reshape(K, Cout)        # [K, Cout]
    w_tiles = (
        w.reshape(K, n_tiles, cout_tile)
         .transpose(1, 0, 2)
         .astype(jnp.bfloat16)
    )                                                                    # [n_tiles, K, tile]

    cost = pl.CostEstimate(
        flops=2 * M_rows * K * Cout,
        transcendentals=0,
        bytes_accessed=patches.size * 2 + w_tiles.size * 2 + M_rows * Cout * 4,
    )

    out_flat = pl.pallas_call(
        relu_matmul_kernel,
        out_shape=jax.ShapeDtypeStruct((M_rows, Cout), jnp.float32),
        grid=(n_tiles,),
        in_specs=[
            # Patches stay resident in VMEM across the Cout grid (constant map).
            pl.BlockSpec((M_rows, K), lambda j: (0, 0)),
            # One contiguous 1 MB weight tile per grid step (double-buffered).
            pl.BlockSpec((None, K, cout_tile), lambda j: (j, 0, 0)),
        ],
        out_specs=pl.BlockSpec((M_rows, cout_tile), lambda j: (0, j)),
        compiler_params=pltpu.CompilerParams(
            dimension_semantics=("parallel",),   # megacore split over Cout (v7x)
        ),
        cost_estimate=cost,
    )(patches, w_tiles)

    # Zero-cost view back to the module's NCHW output layout.
    out_nhwc = out_flat.reshape(N, H, W, Cout)
    return jnp.transpose(out_nhwc, (0, 3, 1, 2)).astype(jnp.float32)


if __name__ == "__main__":
    key = jax.random.PRNGKey(0)
    k_x, k_w = jax.random.split(key)

    # Shapes implied by the module: input [1, 448, 5, 5], conv 448 -> 384, 3x3.
    N, Cin, H, W = 1, 448, 5, 5
    Cout = 384

    x = jax.random.normal(k_x, (N, Cin, H, W), dtype=jnp.float32)
    # Deterministic, Kaiming-ish scaled weights (PyTorch OIHW layout).
    fan_in = Cin * KH * KW
    weight = jax.random.normal(k_w, (Cout, Cin, KH, KW), dtype=jnp.float32)
    weight = weight * (2.0 / fan_in) ** 0.5

    fwd = jax.jit(relu_conv2d)   # fuse the wrapper-side layout plumbing
    out = jax.block_until_ready(fwd(x, weight))

    # Reference: f32 ReLU + conv (module semantics). Tolerance loosened because
    # the kernel feeds bf16 inputs to the MXU (f32 accumulation).
    ref = jax.lax.conv_general_dilated(
        jnp.maximum(x, 0.0), weight,
        window_strides=(1, 1), padding=((1, 1), (1, 1)),
        dimension_numbers=("NCHW", "OIHW", "NCHW"),
    )
    assert out.shape == (N, Cout, H, W)
    assert jnp.allclose(out, ref, atol=5e-2, rtol=5e-2), float(
        jnp.max(jnp.abs(out - ref)))

    print("KERNEL_OK")
</pallas_src>

<mosaic_0001>
module attributes {stable_mosaic.version = 11 : i64} {
  func.func @relu_matmul_kernel(%arg0: i32, %arg1: memref<25x4032xbf16, #tpu.memory_space<vmem>>, %arg2: memref<1x4032x128xbf16, #tpu.memory_space<vmem>>, %arg3: memref<25x128xf32, #tpu.memory_space<vmem>>) attributes {dimension_semantics = [#tpu.dimension_semantics<parallel>], iteration_bounds = array<i64: 3>, scalar_prefetch = 0 : i64, scratch_operands = 0 : i64, tpu.core_type = #tpu.core_type<tc>, window_params = [{pipeline_mode = #tpu.pipeline_mode<synchronous>, transform_indices = @transform_0, window_bounds = array<i64: 25, 4032>}, {transform_indices = @transform_1, window_bounds = array<i64: 1, 4032, 128>}, {transform_indices = @transform_2, window_bounds = array<i64: 25, 128>}]} {
    %c0 = arith.constant 0 : index
    %c0_0 = arith.constant 0 : index
    %0 = vector.load %arg1[%c0, %c0_0] : memref<25x4032xbf16, #tpu.memory_space<vmem>>, vector<25x4032xbf16>
    %cst = arith.constant 0.000000e+00 : bf16
    %1 = vector.broadcast %cst : bf16 to vector<25x4032xbf16>
    %2 = arith.maximumf %0, %1 : vector<25x4032xbf16>
    %c0_1 = arith.constant 0 : index
    %c0_2 = arith.constant 0 : index
    %c0_3 = arith.constant 0 : index
    %3 = vector.load %arg2[%c0_1, %c0_2, %c0_3] : memref<1x4032x128xbf16, #tpu.memory_space<vmem>>, vector<1x4032x128xbf16>
    %4 = vector.shape_cast %3 : vector<1x4032x128xbf16> to vector<4032x128xbf16>
    %cst_4 = arith.constant dense<0.000000e+00> : vector<25x128xf32>
    %5 = tpu.matmul %2, %4, %cst_4 {dimension_numbers = #tpu.dot_dimension_numbers<[1], [0], [0], [1], [0, 0, 1, 1], [], []>} : vector<25x4032xbf16>, vector<4032x128xbf16>, vector<25x128xf32> -> vector<25x128xf32>
    %c0_5 = arith.constant 0 : index
    %c0_6 = arith.constant 0 : index
    %6 = vector.load %arg3[%c0_5, %c0_6] : memref<25x128xf32, #tpu.memory_space<vmem>>, vector<25x128xf32>
    tpu.vector_store %arg3[%c0_5, %c0_6], %5 {strides = array<i32>} : memref<25x128xf32, #tpu.memory_space<vmem>>, vector<25x128xf32>,
    return
  }
  func.func @transform_0(%arg0: i32) -> (i32, i32) {
    %c0_i32 = arith.constant 0 : i32
    %c0_i32_0 = arith.constant 0 : i32
    %c0_i32_1 = arith.constant 0 : i32
    return %c0_i32, %c0_i32_0 : i32, i32
  }
  func.func @transform_1(%arg0: i32) -> (i32, i32, i32) {
    %c0_i32 = arith.constant 0 : i32
    %c0_i32_0 = arith.constant 0 : i32
    %c0_i32_1 = arith.constant 0 : i32
    return %arg0, %c0_i32, %c0_i32_0 : i32, i32, i32
  }
  func.func @transform_2(%arg0: i32) -> (i32, i32) {
    %c0_i32 = arith.constant 0 : i32
    %c0_i32_0 = arith.constant 0 : i32
    return %c0_i32, %arg0 : i32, i32
  }
}

</mosaic_0001>

<bundles_post_ra>
// kernel: relu_conv2d.1
= control target key start
LH: loop header
LB: loop body
LE: loop exit
PB: predicated region body
PF: predicated region fallthrough
CT: control target
= control target key end

     0   :  { %s4599_s9 = smov 0   ;;  %s4601_s10 = smov 0   ;;  %s5138_s0 = inlined_call_operand.vmem [shape: bf16[25,4032], index: 0, kind: input, shape index: {}]   ;;  %s5139_s1 = inlined_call_operand.vmem [shape: bf16[3,4032,128], index: 1, kind: input, shape index: {}]   ;;  %s5140_s2 = inlined_call_operand.vmem [shape: f32[25,384], index: 2, kind: output, shape index: {}]  }
   0x1   :  { %s4603_s11 = smov 0  }
   0x2 LB: > { %s4612_s12 = sadd.s32 4294967295, %s4582_s11   ;;  %s4614_s13 = sadd.s32 1, %s4582_s11   ;;  %s4582_s11 = sphi %s4603_s11, %s5144_s11   ;;  %s4578_s10 = sphi %s4601_s10, %s5143_s10   ;;  %s4574_s9 = sphi %s4599_s9, %s5142_s9  }
   0x3   : > { %s63_s14 = ssub.s32 %s4582_s11, %s4614_s13  ;;  %s66_s15 = sadd.s32 1, %s4578_s10 }
   0x4   : > { %p64_p0 = scmp.eq.s32.totalorder %s63_s14, 0  ;;  %p76_p1 = scmp.ne.s32.totalorder %s4578_s10, %s4574_s9 }
   0x5   : > { %p77_p2 = scmp.eq.s32.totalorder %s4612_s12, 2  ;;  %p3266_p3 = scmp.ge.s32.totalorder %s4582_s11, 1 }
   0x6   : > { %s4622_s16 = scalar_select %p64_p0, %s4578_s10, %s66_s15  }
   0x7   : > { %p4624_p4 = por %p77_p2, %p76_p1  ;;  %p112_p5 = scmp.lt.s32.totalorder %s4582_s11, 4 }
   0x9   : > { %p113_p6 = pnand %p3266_p3, %p112_p5 }
   0xa   : > { %p133_p7 = scmp.lt.s32.totalorder (!%p113_p6), %s4612_s12, 2  ;;  %s130_s24 = sand.u32 (!%p113_p6), 1, %s4574_s9  }
   0xb   : > { %116 = sbr.rel (%p113_p6) target bundleno = 448 (0x1c0), region = 28  ;;  %s3267_s25 = sshll.u32 (!%p113_p6), %s130_s24, 5 }
   0xc   : > { %s5112_s26 = scalar_lea.vmem (!%p113_p6), [#allocation2], %s3267_s25 }
  0x10   : > { %s134_s18 = scalar_select %p133_p7, %s4612_s12, 2  ;;  %v139_v20 = vld [vmem:[%s5138_s0] sm:$0xff]  ;;  %v140_v24 = vld [vmem:[%s5138_s0 + $0x8] sm:$0xff]  ;;  %vm2539_vm0 = vcmask 523264  }
  0x11   : > { %v155_v21 = vld [vmem:[%s5138_s0 + $0x80] sm:$0xff]  ;;  %v156_v27 = vld [vmem:[%s5138_s0 + $0x88] sm:$0xff]  ;;  %v203_v28 = vunpack.c.l.bf16 %v139_v20  ;;  %v204_v30 = vunpack.c.h.bf16 %v139_v20  ;;  %v205_v34 = vunpack.c.l.bf16 %v140_v24  ;;  %v206_v36 = vunpack.c.h.bf16 %v140_v24  ;;  %s4280_s9 = sshll.u32 (%p4624_p4), %s4612_s12, 3 }
  0x12   : > { %s4535_s19 = smul.u32 2016, %s134_s18  ;;  %v235_v29 = vunpack.c.l.bf16 %v155_v21  ;;  %v236_v31 = vunpack.c.h.bf16 %v155_v21  ;;  %v237_v35 = vunpack.c.l.bf16 %v156_v27  ;;  %v238_v37 = vunpack.c.h.bf16 %v156_v27  ;;  %v171_v63 = vld [vmem:[%s5138_s0 + $0x100] sm:$0xff]  ;;  %s3166_s29 = scalar_lea.vmem (%p4624_p4), %s5140_s2, %s4280_s9 }
  0x13   : > { %v331_v40 = vmax.f32 %v203_v28, 0.0  ;;  %v332_v42 = vmax.f32 %v204_v30, 0.0  ;;  %v333_v46 = vmax.f32 %v205_v34, 0.0  ;;  %v334_v48 = vmax.f32 %v206_v36, 0.0 }
  0x14   : > { %s4633_s22 = scalar_lea.vmem %s5139_s1, %s4535_s19  ;;  %v363_v41 = vmax.f32 %v235_v29, 0.0  ;;  %v364_v43 = vmax.f32 %v236_v31, 0.0  ;;  %v365_v47 = vmax.f32 %v237_v35, 0.0  ;;  %v366_v49 = vmax.f32 %v238_v37, 0.0 }
  0x15   : > { %v4290_v0 = vld [vmem:[%s4633_s22 + $0x38] sm:$0xff]  ;;  %v4289_v4 = vld [vmem:[%s4633_s22 + $0x30] sm:$0xff]  ;;  %v4288_v8 = vld [vmem:[%s4633_s22 + $0x28] sm:$0xff] }
  0x16   : > { %v4298_v1 = vld [vmem:[%s4633_s22 + $0x78] sm:$0xff]  ;;  %2546 = vmatpush.bf16.msra.mxu0 %v4290_v0  ;;  %v4297_v5 = vld [vmem:[%s4633_s22 + $0x70] sm:$0xff]  ;;  %v4296_v9 = vld [vmem:[%s4633_s22 + $0x68] sm:$0xff]  ;;  %v459_v54 = vpack.c.bf16 %v363_v41, %v331_v40  ;;  %v460_v55 = vpack.c.bf16 %v364_v43, %v332_v42  ;;  %v461_v56 = vpack.c.bf16 %v365_v47, %v333_v46  ;;  %v462_v57 = vpack.c.bf16 %v366_v49, %v334_v48 }
  0x17   : > { %v4306_v2 = vld [vmem:[%s4633_s22 + $0xb8] sm:$0xff]  ;;  %2565 = vmatpush.bf16.msra.mxu1 %v4298_v1  ;;  %v4305_v6 = vld [vmem:[%s4633_s22 + $0xb0] sm:$0xff]  ;;  %v4304_v10 = vld [vmem:[%s4633_s22 + $0xa8] sm:$0xff] }
  0x18   : > { %v4314_v3 = vld [vmem:[%s4633_s22 + $0xf8] sm:$0xff]  ;;  %2584 = vmatpush.bf16.msra.mxu2 %v4306_v2  ;;  %v4313_v7 = vld [vmem:[%s4633_s22 + $0xf0] sm:$0xff]  ;;  %v4312_v11 = vld [vmem:[%s4633_s22 + $0xe8] sm:$0xff] }
  0x19   : > { %2603 = vmatpush.bf16.msra.mxu3 %v4314_v3  ;;  %v4287_v12 = vld [vmem:[%s4633_s22 + $0x20] sm:$0xff]  ;;  %v4286_v16 = vld [vmem:[%s4633_s22 + $0x18] sm:$0xff]  ;;  %v4285_v22 = vld [vmem:[%s4633_s22 + $0x10] sm:$0xff] }
  0x1a   : > { %2547 = vmatpush.bf16.msra.mxu0 %v4289_v4  ;;  %v4295_v13 = vld [vmem:[%s4633_s22 + $0x60] sm:$0xff]  ;;  %v4294_v17 = vld [vmem:[%s4633_s22 + $0x58] sm:$0xff]  ;;  %v4293_v23 = vld [vmem:[%s4633_s22 + $0x50] sm:$0xff] }
  0x1b   : > { %2566 = vmatpush.bf16.msra.mxu1 %v4297_v5  ;;  %v4303_v14 = vld [vmem:[%s4633_s22 + $0xa0] sm:$0xff]  ;;  %v4302_v18 = vld [vmem:[%s4633_s22 + $0x98] sm:$0xff]  ;;  %v4301_v25 = vld [vmem:[%s4633_s22 + $0x90] sm:$0xff] }
  0x1c   : > { %2585 = vmatpush.bf16.msra.mxu2 %v4305_v6  ;;  %v4311_v15 = vld [vmem:[%s4633_s22 + $0xe0] sm:$0xff]  ;;  %v4310_v19 = vld [vmem:[%s4633_s22 + $0xd8] sm:$0xff]  ;;  %v4309_v26 = vld [vmem:[%s4633_s22 + $0xd0] sm:$0xff]  ;;  %v267_v6 = vunpack.c.l.bf16 %v171_v63 }
  0x1d   : > { %2604 = vmatpush.bf16.msra.mxu3 %v4313_v7  ;;  %v4284_v32 = vld [vmem:[%s4633_s22 + $0x8] sm:$0xff]  ;;  %v4283_v44 = vld [vmem:[%s4633_s22] sm:$0xff]  ;;  %v4338_v52 = vld [vmem:[%s4633_s22 + $0x1b8] sm:$0xff] }
  0x1e   : > { %2548 = vmatpush.bf16.msra.mxu0 %v4288_v8  ;;  %v4292_v33 = vld [vmem:[%s4633_s22 + $0x48] sm:$0xff]  ;;  %v4291_v45 = vld [vmem:[%s4633_s22 + $0x40] sm:$0xff]  ;;  %v4322_v53 = vld [vmem:[%s4633_s22 + $0x138] sm:$0xff]  ;;  %v268_v8 = vunpack.c.h.bf16 %v171_v63 }
  0x1f   : > { %2567 = vmatpush.bf16.msra.mxu1 %v4296_v9  ;;  %v4300_v38 = vld [vmem:[%s4633_s22 + $0x88] sm:$0xff]  ;;  %v4299_v50 = vld [vmem:[%s4633_s22 + $0x80] sm:$0xff]  ;;  %v4330_v58 = vld [vmem:[%s4633_s22 + $0x178] sm:$0xff] }
  0x20   : > { %2586 = vmatpush.bf16.msra.mxu2 %v4304_v10  ;;  %v4308_v39 = vld [vmem:[%s4633_s22 + $0xc8] sm:$0xff]  ;;  %v4307_v51 = vld [vmem:[%s4633_s22 + $0xc0] sm:$0xff]  ;;  %v4346_v59 = vld [vmem:[%s4633_s22 + $0x1f8] sm:$0xff]  ;;  %v396_v20 = vmax.f32 %v268_v8, 0.0 }
  0x21   : > { %2605 = vmatpush.bf16.msra.mxu3 %v4312_v11  ;;  %v4337_v60 = vld [vmem:[%s4633_s22 + $0x1b0] sm:$0xff]  ;;  %v187_v0 = vld [vmem:[%s5138_s0 + $0x180] sm:$0x11]  ;;  %v172_v2 = vld [vmem:[%s5138_s0 + $0x108] sm:$0xff] }
  0x22   : > { %2549 = vmatpush.bf16.msra.mxu0 %v4287_v12  ;;  %v4321_v61 = vld [vmem:[%s4633_s22 + $0x130] sm:$0xff]  ;;  %v188_v3 = vld [vmem:[%s5138_s0 + $0x188] sm:$0x11]  ;;  %v299_v7 = vunpack.c.l.bf16 %v187_v0  ;;  %v300_v9 = vunpack.c.h.bf16 %v187_v0  ;;  %v269_v10 = vunpack.c.l.bf16 %v172_v2  ;;  %v270_v12 = vunpack.c.h.bf16 %v172_v2  ;;  %v4343_v27 = vld [vmem:[%s4633_s22 + $0x1e0] sm:$0xff] }
  0x23   : > { %2568 = vmatpush.bf16.msra.mxu1 %v4295_v13  ;;  %v4329_v62 = vld [vmem:[%s4633_s22 + $0x170] sm:$0xff]  ;;  %v4336_v4 = vld [vmem:[%s4633_s22 + $0x1a8] sm:$0xff]  ;;  %v301_v11 = vunpack.c.l.bf16 %v188_v3  ;;  %v302_v13 = vunpack.c.h.bf16 %v188_v3  ;;  %v4334_v28 = vld [vmem:[%s4633_s22 + $0x198] sm:$0xff] }
  0x24   : > { %2587 = vmatpush.bf16.msra.mxu2 %v4303_v14  ;;  %v4345_v1 = vld [vmem:[%s4633_s22 + $0x1f0] sm:$0xff]  ;;  %v4320_v5 = vld [vmem:[%s4633_s22 + $0x128] sm:$0xff]  ;;  %v428_v21 = vmax.f32 %v300_v9, 0.0  ;;  %v398_v24 = vmax.f32 %v270_v12, 0.0  ;;  %v4318_v29 = vld [vmem:[%s4633_s22 + $0x118] sm:$0xff] }
  0x25   : > { %2606 = vmatpush.bf16.msra.mxu3 %v4311_v15  ;;  %v4328_v14 = vld [vmem:[%s4633_s22 + $0x168] sm:$0xff]  ;;  %v4326_v34 = vld [vmem:[%s4633_s22 + $0x158] sm:$0xff]  ;;  %v4333_v36 = vld [vmem:[%s4633_s22 + $0x190] sm:$0xff] }
  0x26   : > { %2550 = vmatpush.bf16.msra.mxu0 %v4286_v16  ;;  %v4344_v15 = vld [vmem:[%s4633_s22 + $0x1e8] sm:$0xff]  ;;  %v4335_v16 = vld [vmem:[%s4633_s22 + $0x1a0] sm:$0xff]  ;;  %v492_v31 = vpack.c.bf16 %v428_v21, %v396_v20  ;;  %v4342_v35 = vld [vmem:[%s4633_s22 + $0x1d8] sm:$0xff] }
  0x27   : > { %2569 = vmatpush.bf16.msra.mxu1 %v4294_v17  ;;  %v4319_v17 = vld [vmem:[%s4633_s22 + $0x120] sm:$0xff]  ;;  %v4317_v37 = vld [vmem:[%s4633_s22 + $0x110] sm:$0xff]  ;;  %v142_v42 = vld [vmem:[%s5138_s0 + $0x18] sm:$0xff] }
  0x28   : > { %2588 = vmatpush.bf16.msra.mxu2 %v4302_v18  ;;  %v395_v18 = vmax.f32 %v267_v6, 0.0  ;;  %v157_v40 = vld [vmem:[%s5138_s0 + $0x90] sm:$0xff]  ;;  %v158_v43 = vld [vmem:[%s5138_s0 + $0x98] sm:$0xff]  ;;  %v4323_v2 = vld [vmem:[%s4633_s22 + $0x140] sm:$0xff] }
  0x29   : > { %2607 = vmatpush.bf16.msra.mxu3 %v4310_v19  ;;  %v427_v19 = vmax.f32 %v299_v7, 0.0  ;;  %v4341_v41 = vld [vmem:[%s4633_s22 + $0x1d0] sm:$0xff]  ;;  %v239_v47 = vunpack.c.l.bf16 %v157_v40  ;;  %v240_v49 = vunpack.c.h.bf16 %v157_v40  ;;  %v4339_v3 = vld [vmem:[%s4633_s22 + $0x1c0] sm:$0xff]  ;;  %v4362_v6 = vld [vmem:[%s4633_s22 + $0x278] sm:$0xff] }
  0x2a   : > { %2551 = vmatpush.bf16.msra.mxu0 %v4285_v22  ;;  %v397_v22 = vmax.f32 %v269_v10, 0.0  ;;  %v4378_v7 = vld [vmem:[%s4633_s22 + $0x2f8] sm:$0xff]  ;;  %v4369_v9 = vld [vmem:[%s4633_s22 + $0x2b0] sm:$0xff] }
  0x2b   : > { %2570 = vmatpush.bf16.msra.mxu1 %v4293_v23  ;;  %v429_v23 = vmax.f32 %v301_v11, 0.0  ;;  %v491_v30 = vpack.c.bf16 %v427_v19, %v395_v18  ;;  %v368_v63 = vmax.f32 %v240_v49, 0.0  ;;  %v189_v18 = vld [vmem:[%s5138_s0 + $0x190] sm:$0x11]  ;;  %v4352_v19 = vld [vmem:[%s4633_s22 + $0x228] sm:$0xff]  ;;  %v174_v20 = vld [vmem:[%s5138_s0 + $0x118] sm:$0xff] }
  0x2c   : > { %2589 = vmatpush.bf16.msra.mxu2 %v4301_v25  ;;  %v430_v25 = vmax.f32 %v302_v13, 0.0  ;;  %v4353_v13 = vld [vmem:[%s4633_s22 + $0x230] sm:$0xff]  ;;  %v190_v21 = vld [vmem:[%s5138_s0 + $0x198] sm:$0x11] }
  0x2d   : > { %2608 = vmatpush.bf16.msra.mxu3 %v4309_v26  ;;  %v4327_v26 = vld [vmem:[%s4633_s22 + $0x160] sm:$0xff]  ;;  %v4365_v49 = vld [vmem:[%s4633_s22 + $0x290] sm:$0xff] }
  0x2e   : > { %2552 = vmatpush.bf16.msra.mxu0 %v4284_v32  ;;  %v493_v32 = vpack.c.bf16 %v429_v23, %v397_v22  ;;  %v4360_v22 = vld [vmem:[%s4633_s22 + $0x268] sm:$0xff] }
  0x2f   : > { %2571 = vmatpush.bf16.msra.mxu1 %v4292_v33  ;;  %v494_v33 = vpack.c.bf16 %v430_v25, %v398_v24  ;;  %v4376_v23 = vld [vmem:[%s4633_s22 + $0x2e8] sm:$0xff]  ;;  %v4367_v24 = vld [vmem:[%s4633_s22 + $0x2a0] sm:$0xff] }
  0x30   : > { %2590 = vmatpush.bf16.msra.mxu2 %v4300_v38  ;;  %v4325_v38 = vld [vmem:[%s4633_s22 + $0x150] sm:$0xff] }
  0x31   : > { %2609 = vmatpush.bf16.msra.mxu3 %v4308_v39  ;;  %v141_v39 = vld [vmem:[%s5138_s0 + $0x10] sm:$0xff] }
  0x32   : > { %2553 = vmatpush.bf16.msra.mxu0 %v4283_v44  ;;  %v4332_v44 = vld [vmem:[%s4633_s22 + $0x188] sm:$0xff]  ;;  %v207_v46 = vunpack.c.l.bf16 %v141_v39  ;;  %v208_v48 = vunpack.c.h.bf16 %v141_v39 }
  0x33   : > { %2572 = vmatpush.bf16.msra.mxu1 %v4291_v45  ;;  %v4316_v45 = vld [vmem:[%s4633_s22 + $0x108] sm:$0xff] }
  0x34   : > { %2591 = vmatpush.bf16.msra.mxu2 %v4299_v50  ;;  %v209_v50 = vunpack.c.l.bf16 %v142_v42 }
  0x35   : > { %2610 = vmatpush.bf16.msra.mxu3 %v4307_v51  ;;  %2554 = vmatmul.bf16.vlgmr.msra.gmra.mxu0 %v459_v54  ;;  %v241_v51 = vunpack.c.l.bf16 %v158_v43  ;;  %v210_v54 = vunpack.c.h.bf16 %v142_v42 }
  0x36   : > { %2622 = vmatpush.bf16.msrb.mxu0 %v4322_v53  ;;  %2573 = vmatmul.bf16.vlgmr.msra.gmra.mxu1 %v460_v55  ;;  %v4340_v53 = vld [vmem:[%s4633_s22 + $0x1c8] sm:$0xff]  ;;  %v242_v55 = vunpack.c.h.bf16 %v158_v43  ;;  %v337_v0 = vmax.f32 %v209_v50, 0.0 }
  0x37   : > { %2592 = vmatmul.bf16.vlgmr.msra.gmra.mxu2 %v461_v56  ;;  %2641 = vmatpush.bf16.msrb.mxu1 %v4330_v58  ;;  %v4331_v56 = vld [vmem:[%s4633_s22 + $0x180] sm:$0xff]  ;;  %v335_v58 = vmax.f32 %v207_v46, 0.0  ;;  %v4358_v46 = vld [vmem:[%s4633_s22 + $0x258] sm:$0xff] }
  0x38   : > { %2660 = vmatpush.bf16.msrb.mxu2 %v4338_v52  ;;  %2611 = vmatmul.bf16.vlgmr.msra.gmra.mxu3 %v462_v57  ;;  %v4324_v52 = vld [vmem:[%s4633_s22 + $0x148] sm:$0xff]  ;;  %v4315_v57 = vld [vmem:[%s4633_s22 + $0x100] sm:$0xff] }
  0x39   : > { %2679 = vmatpush.bf16.msrb.mxu3 %v4346_v59  ;;  %v367_v59 = vmax.f32 %v239_v47, 0.0  ;;  %v4374_v47 = vld [vmem:[%s4633_s22 + $0x2d8] sm:$0xff] }
  0x3a   : > { %2623 = vmatpush.bf16.msrb.mxu0 %v4321_v61  ;;  %v4354_v61 = vld [vmem:[%s4633_s22 + $0x238] sm:$0xff] }
  0x3b   : > { %2642 = vmatpush.bf16.msrb.mxu1 %v4329_v62  ;;  %v336_v62 = vmax.f32 %v208_v48, 0.0  ;;  %v463_v8 = vpack.c.bf16 %v367_v59, %v335_v58  ;;  %v159_v58 = vld [vmem:[%s5138_s0 + $0xa0] sm:$0xff]  ;;  %v4348_v59 = vld [vmem:[%s4633_s22 + $0x208] sm:$0xff] }
  0x3c   : > { %2661 = vmatpush.bf16.msrb.mxu2 %v4337_v60  ;;  %v4370_v60 = vld [vmem:[%s4633_s22 + $0x2b8] sm:$0xff] }
  0x3d   : > { %2680 = vmatpush.bf16.msrb.mxu3 %v4345_v1  ;;  %v369_v1 = vmax.f32 %v241_v51, 0.0  ;;  %v464_v10 = vpack.c.bf16 %v368_v63, %v336_v62  ;;  %v4356_v62 = vld [vmem:[%s4633_s22 + $0x248] sm:$0xff] }
  0x3e   : > { %2624 = vmatpush.bf16.msrb.mxu0 %v4320_v5  ;;  %v370_v5 = vmax.f32 %v242_v55, 0.0  ;;  %v4373_v55 = vld [vmem:[%s4633_s22 + $0x2d0] sm:$0xff]  ;;  %v4372_v63 = vld [vmem:[%s4633_s22 + $0x2c8] sm:$0xff] }
  0x3f   : > { %2643 = vmatpush.bf16.msrb.mxu1 %v4328_v14  ;;  %v465_v11 = vpack.c.bf16 %v369_v1, %v337_v0  ;;  %v4361_v14 = vld [vmem:[%s4633_s22 + $0x270] sm:$0xff]  ;;  %v4363_v0 = vld [vmem:[%s4633_s22 + $0x280] sm:$0xff] }
  0x40   : > { %2662 = vmatpush.bf16.msrb.mxu2 %v4336_v4  ;;  %v338_v4 = vmax.f32 %v210_v54, 0.0  ;;  %v4357_v54 = vld [vmem:[%s4633_s22 + $0x250] sm:$0xff] }
  0x41   : > { %2681 = vmatpush.bf16.msrb.mxu3 %v4344_v15  ;;  %v4377_v15 = vld [vmem:[%s4633_s22 + $0x2f0] sm:$0xff] }
  0x42   : > { %2625 = vmatpush.bf16.msrb.mxu0 %v4319_v17  ;;  %v466_v12 = vpack.c.bf16 %v370_v5, %v338_v4  ;;  %v173_v17 = vld [vmem:[%s5138_s0 + $0x110] sm:$0xff]  ;;  %v244_v4 = vunpack.c.h.bf16 %v159_v58 }
  0x43   : > { %2644 = vmatpush.bf16.msrb.mxu1 %v4327_v26  ;;  %v271_v25 = vunpack.c.l.bf16 %v173_v17  ;;  %v303_v26 = vunpack.c.l.bf16 %v189_v18 }
  0x44   : > { %2663 = vmatpush.bf16.msrb.mxu2 %v4335_v16  ;;  %v4368_v16 = vld [vmem:[%s4633_s22 + $0x2a8] sm:$0xff] }
  0x45   : > { %2682 = vmatpush.bf16.msrb.mxu3 %v4343_v27  ;;  %2559 = vmatmul.bf16.gmra.mxu0 %v491_v30  ;;  %v272_v27 = vunpack.c.h.bf16 %v173_v17  ;;  %v305_v30 = vunpack.c.l.bf16 %v190_v21 }
  0x46   : > { %2626 = vmatpush.bf16.msrb.mxu0 %v4318_v29  ;;  %2578 = vmatmul.bf16.gmra.mxu1 %v492_v31  ;;  %v273_v29 = vunpack.c.l.bf16 %v174_v20  ;;  %v4351_v31 = vld [vmem:[%s4633_s22 + $0x220] sm:$0xff] }
  0x47   : > { %2597 = vmatmul.bf16.gmra.mxu2 %v493_v32  ;;  %2645 = vmatpush.bf16.msrb.mxu1 %v4326_v34  ;;  %v274_v32 = vunpack.c.h.bf16 %v174_v20  ;;  %v4359_v34 = vld [vmem:[%s4633_s22 + $0x260] sm:$0xff]  ;;  %v400_v39 = vmax.f32 %v272_v27, 0.0  ;;  %v433_v42 = vmax.f32 %v305_v30, 0.0  ;;  %v4385_v30 = vld [vmem:[%s4633_s22 + $0x330] sm:$0xff] }
  0x48   : > { %2664 = vmatpush.bf16.msrb.mxu2 %v4334_v28  ;;  %2616 = vmatmul.bf16.gmra.mxu3 %v494_v33  ;;  %v304_v28 = vunpack.c.h.bf16 %v189_v18  ;;  %v306_v33 = vunpack.c.h.bf16 %v190_v21  ;;  %v372_v18 = vmax.f32 %v244_v4, 0.0  ;;  %v4410_v21 = vld [vmem:[%s4633_s22 + $0x3f8] sm:$0xff] }
  0x49   : > { %2683 = vmatpush.bf16.msrb.mxu3 %v4342_v35  ;;  %v4375_v35 = vld [vmem:[%s4633_s22 + $0x2e0] sm:$0xff]  ;;  %v402_v43 = vmax.f32 %v274_v32, 0.0  ;;  %v4400_v32 = vld [vmem:[%s4633_s22 + $0x3a8] sm:$0xff] }
  0x4a   : > { %2627 = vmatpush.bf16.msrb.mxu0 %v4317_v37  ;;  %v431_v37 = vmax.f32 %v303_v26, 0.0  ;;  %v432_v40 = vmax.f32 %v304_v28, 0.0  ;;  %v4393_v26 = vld [vmem:[%s4633_s22 + $0x370] sm:$0xff] }
  0x4b   : > { %2646 = vmatpush.bf16.msrb.mxu1 %v4325_v38  ;;  %v4366_v38 = vld [vmem:[%s4633_s22 + $0x298] sm:$0xff] }
  0x4c   : > { %2665 = vmatpush.bf16.msrb.mxu2 %v4333_v36  ;;  %v399_v36 = vmax.f32 %v271_v25, 0.0  ;;  %v496_v50 = vpack.c.bf16 %v432_v40, %v400_v39  ;;  %v4408_v39 = vld [vmem:[%s4633_s22 + $0x3e8] sm:$0xff]  ;;  %v4399_v40 = vld [vmem:[%s4633_s22 + $0x3a0] sm:$0xff] }
  0x4d   : > { %2684 = vmatpush.bf16.msrb.mxu3 %v4341_v41  ;;  %v401_v41 = vmax.f32 %v273_v29, 0.0 }
  0x4e   : > { %2628 = vmatpush.bf16.msrb.mxu0 %v4316_v45  ;;  %v4350_v45 = vld [vmem:[%s4633_s22 + $0x218] sm:$0xff]  ;;  %v495_v48 = vpack.c.bf16 %v431_v37, %v399_v36  ;;  %v4384_v36 = vld [vmem:[%s4633_s22 + $0x328] sm:$0xff] }
  0x4f   : > { %2647 = vmatpush.bf16.msrb.mxu1 %v4324_v52  ;;  %v497_v51 = vpack.c.bf16 %v433_v42, %v401_v41  ;;  %v176_v37 = vld [vmem:[%s5138_s0 + $0x128] sm:$0xff]  ;;  %v4391_v41 = vld [vmem:[%s4633_s22 + $0x360] sm:$0xff] }
  0x50   : > { %2666 = vmatpush.bf16.msrb.mxu2 %v4332_v44  ;;  %v434_v44 = vmax.f32 %v306_v33, 0.0  ;;  %v4392_v33 = vld [vmem:[%s4633_s22 + $0x368] sm:$0xff] }
  0x51   : > { %2685 = vmatpush.bf16.msrb.mxu3 %v4340_v53  ;;  %v4349_v53 = vld [vmem:[%s4633_s22 + $0x210] sm:$0xff] }
  0x52   : > { %2629 = vmatpush.bf16.msrb.mxu0 %v4315_v57  ;;  %v498_v52 = vpack.c.bf16 %v434_v44, %v402_v43  ;;  %v143_v57 = vld [vmem:[%s5138_s0 + $0x20] sm:$0xff] }
  0x53   : > { %2648 = vmatpush.bf16.msrb.mxu1 %v4323_v2  ;;  %v211_v1 = vunpack.c.l.bf16 %v143_v57  ;;  %v243_v2 = vunpack.c.l.bf16 %v159_v58 }
  0x54   : > { %2667 = vmatpush.bf16.msrb.mxu2 %v4331_v56  ;;  %v4364_v56 = vld [vmem:[%s4633_s22 + $0x288] sm:$0xff] }
  0x55   : > { %2686 = vmatpush.bf16.msrb.mxu3 %v4339_v3  ;;  %2630 = vmatmul.bf16.vlgmr.msrb.gmra.mxu0 %v463_v8  ;;  %v212_v3 = vunpack.c.h.bf16 %v143_v57  ;;  %v4347_v8 = vld [vmem:[%s4633_s22 + $0x200] sm:$0xff] }
  0x56   : > { %2698 = vmatpush.bf16.msra.mxu0 %v4354_v61  ;;  %2649 = vmatmul.bf16.vlgmr.msrb.gmra.mxu1 %v464_v10  ;;  %v160_v61 = vld [vmem:[%s5138_s0 + $0xa8] sm:$0xff] }
  0x57   : > { %2717 = vmatpush.bf16.msra.mxu1 %v4362_v6  ;;  %2668 = vmatmul.bf16.vlgmr.msrb.gmra.mxu2 %v465_v11  ;;  %v245_v6 = vunpack.c.l.bf16 %v160_v61  ;;  %v246_v10 = vunpack.c.h.bf16 %v160_v61  ;;  %v4355_v11 = vld [vmem:[%s4633_s22 + $0x240] sm:$0xff]  ;;  %v340_v17 = vmax.f32 %v212_v3, 0.0 }
  0x58   : > { %2736 = vmatpush.bf16.msra.mxu2 %v4370_v60  ;;  %2687 = vmatmul.bf16.vlgmr.msrb.gmra.mxu3 %v466_v12  ;;  %v144_v60 = vld [vmem:[%s5138_s0 + $0x28] sm:$0xff]  ;;  %v4371_v12 = vld [vmem:[%s4633_s22 + $0x2c0] sm:$0xff] }
  0x59   : > { %2755 = vmatpush.bf16.msra.mxu3 %v4378_v7  ;;  %v213_v5 = vunpack.c.l.bf16 %v144_v60  ;;  %v4402_v7 = vld [vmem:[%s4633_s22 + $0x3b8] sm:$0xff]  ;;  %v373_v20 = vmax.f32 %v245_v6, 0.0  ;;  %v468_v27 = vpack.c.bf16 %v372_v18, %v340_v17  ;;  %v4381_v6 = vld [vmem:[%s4633_s22 + $0x310] sm:$0xff]  ;;  %v4387_v17 = vld [vmem:[%s4633_s22 + $0x340] sm:$0xff] }
  0x5a   : > { %2699 = vmatpush.bf16.msra.mxu0 %v4353_v13  ;;  %v339_v13 = vmax.f32 %v211_v1, 0.0 }
  0x5b   : > { %2718 = vmatpush.bf16.msra.mxu1 %v4361_v14  ;;  %v371_v14 = vmax.f32 %v243_v2, 0.0  ;;  %v4389_v2 = vld [vmem:[%s4633_s22 + $0x350] sm:$0xff] }
  0x5c   : > { %2737 = vmatpush.bf16.msra.mxu2 %v4369_v9  ;;  %v214_v9 = vunpack.c.h.bf16 %v144_v60 }
  0x5d   : > { %2756 = vmatpush.bf16.msra.mxu3 %v4377_v15  ;;  %v4386_v15 = vld [vmem:[%s4633_s22 + $0x338] sm:$0xff]  ;;  %v467_v25 = vpack.c.bf16 %v371_v14, %v339_v13 }
  0x5e   : > { %2700 = vmatpush.bf16.msra.mxu0 %v4352_v19  ;;  %v341_v19 = vmax.f32 %v213_v5, 0.0  ;;  %v146_v13 = vld [vmem:[%s5138_s0 + $0x38] sm:$0xff] }
  0x5f   : > { %2719 = vmatpush.bf16.msra.mxu1 %v4360_v22  ;;  %v4401_v22 = vld [vmem:[%s4633_s22 + $0x3b0] sm:$0xff]  ;;  %v162_v14 = vld [vmem:[%s5138_s0 + $0xb8] sm:$0xff] }
  0x60   : > { %2738 = vmatpush.bf16.msra.mxu2 %v4368_v16  ;;  %v4394_v16 = vld [vmem:[%s4633_s22 + $0x378] sm:$0xff]  ;;  %v469_v28 = vpack.c.bf16 %v373_v20, %v341_v19 }
  0x61   : > { %2757 = vmatpush.bf16.msra.mxu3 %v4376_v23  ;;  %v342_v23 = vmax.f32 %v214_v9, 0.0  ;;  %v4388_v9 = vld [vmem:[%s4633_s22 + $0x348] sm:$0xff]  ;;  %v4434_v20 = vld [vmem:[%s4633_s22 + $0x4b8] sm:$0xff] }
  0x62   : > { %2701 = vmatpush.bf16.msra.mxu0 %v4351_v31  ;;  %v4409_v31 = vld [vmem:[%s4633_s22 + $0x3f0] sm:$0xff] }
  0x63   : > { %2720 = vmatpush.bf16.msra.mxu1 %v4359_v34  ;;  %v175_v34 = vld [vmem:[%s5138_s0 + $0x120] sm:$0xff] }
  0x64   : > { %2739 = vmatpush.bf16.msra.mxu2 %v4367_v24  ;;  %v374_v24 = vmax.f32 %v246_v10, 0.0  ;;  %v275_v42 = vunpack.c.l.bf16 %v175_v34  ;;  %v276_v44 = vunpack.c.h.bf16 %v175_v34  ;;  %v145_v10 = vld [vmem:[%s5138_s0 + $0x30] sm:$0xff] }
  0x65   : > { %2758 = vmatpush.bf16.msra.mxu3 %v4375_v35  ;;  %2635 = vmatmul.bf16.gmra.mxu0 %v495_v48  ;;  %v191_v35 = vld [vmem:[%s5138_s0 + $0x1a0] sm:$0x11]  ;;  %v215_v18 = vunpack.c.l.bf16 %v145_v10  ;;  %v4433_v34 = vld [vmem:[%s4633_s22 + $0x4b0] sm:$0xff] }
  0x66   : > { %2702 = vmatpush.bf16.msra.mxu0 %v4350_v45  ;;  %2654 = vmatmul.bf16.gmra.mxu1 %v496_v50  ;;  %v470_v29 = vpack.c.bf16 %v374_v24, %v342_v23  ;;  %v307_v43 = vunpack.c.l.bf16 %v191_v35  ;;  %v308_v45 = vunpack.c.h.bf16 %v191_v35  ;;  %v4383_v48 = vld [vmem:[%s4633_s22 + $0x320] sm:$0xff]  ;;  %v217_v23 = vunpack.c.l.bf16 %v146_v13 }
  0x67   : > { %2721 = vmatpush.bf16.msra.mxu1 %v4358_v46  ;;  %2673 = vmatmul.bf16.gmra.mxu2 %v497_v51  ;;  %v277_v46 = vunpack.c.l.bf16 %v176_v37  ;;  %v4407_v51 = vld [vmem:[%s4633_s22 + $0x3e0] sm:$0xff]  ;;  %v249_v24 = vunpack.c.l.bf16 %v162_v14 }
  0x68   : > { %2740 = vmatpush.bf16.msra.mxu2 %v4366_v38  ;;  %2692 = vmatmul.bf16.gmra.mxu3 %v498_v52  ;;  %v192_v38 = vld [vmem:[%s5138_s0 + $0x1a8] sm:$0x11]  ;;  %v4398_v52 = vld [vmem:[%s4633_s22 + $0x398] sm:$0xff]  ;;  %v436_v57 = vmax.f32 %v308_v45, 0.0 }
  0x69   : > { %2759 = vmatpush.bf16.msra.mxu3 %v4374_v47  ;;  %v309_v47 = vunpack.c.l.bf16 %v192_v38  ;;  %v310_v50 = vunpack.c.h.bf16 %v192_v38  ;;  %v405_v58 = vmax.f32 %v277_v46, 0.0  ;;  %v377_v38 = vmax.f32 %v249_v24, 0.0  ;;  %v4428_v24 = vld [vmem:[%s4633_s22 + $0x488] sm:$0xff] }
  0x6a   : > { %2703 = vmatpush.bf16.msra.mxu0 %v4349_v53  ;;  %v403_v53 = vmax.f32 %v275_v42, 0.0  ;;  %v4417_v42 = vld [vmem:[%s4633_s22 + $0x430] sm:$0xff] }
  0x6b   : > { %2722 = vmatpush.bf16.msra.mxu1 %v4357_v54  ;;  %v435_v54 = vmax.f32 %v307_v43, 0.0  ;;  %v438_v61 = vmax.f32 %v310_v50, 0.0  ;;  %v4424_v50 = vld [vmem:[%s4633_s22 + $0x468] sm:$0xff] }
  0x6c   : > { %2741 = vmatpush.bf16.msra.mxu2 %v4365_v49  ;;  %v278_v49 = vunpack.c.h.bf16 %v176_v37  ;;  %v345_v37 = vmax.f32 %v217_v23, 0.0 }
  0x6d   : > { %2760 = vmatpush.bf16.msra.mxu3 %v4373_v55  ;;  %v4390_v55 = vld [vmem:[%s4633_s22 + $0x358] sm:$0xff]  ;;  %v499_v1 = vpack.c.bf16 %v435_v54, %v403_v53  ;;  %v193_v53 = vld [vmem:[%s5138_s0 + $0x1b0] sm:$0x11]  ;;  %v4431_v54 = vld [vmem:[%s4633_s22 + $0x4a0] sm:$0xff] }
  0x6e   : > { %2704 = vmatpush.bf16.msra.mxu0 %v4348_v59  ;;  %v437_v59 = vmax.f32 %v309_v47, 0.0  ;;  %v406_v60 = vmax.f32 %v278_v49, 0.0  ;;  %v473_v46 = vpack.c.bf16 %v377_v38, %v345_v37  ;;  %v4416_v49 = vld [vmem:[%s4633_s22 + $0x428] sm:$0xff]  ;;  %v4466_v38 = vld [vmem:[%s4633_s22 + $0x5b8] sm:$0xff] }
  0x6f   : > { %2723 = vmatpush.bf16.msra.mxu1 %v4356_v62  ;;  %v4382_v62 = vld [vmem:[%s4633_s22 + $0x318] sm:$0xff] }
  0x70   : > { %2742 = vmatpush.bf16.msra.mxu2 %v4364_v56  ;;  %v404_v56 = vmax.f32 %v276_v44, 0.0  ;;  %v501_v4 = vpack.c.bf16 %v437_v59, %v405_v58  ;;  %v502_v5 = vpack.c.bf16 %v438_v61, %v406_v60  ;;  %v4441_v44 = vld [vmem:[%s4633_s22 + $0x4f0] sm:$0xff]  ;;  %v4423_v58 = vld [vmem:[%s4633_s22 + $0x460] sm:$0xff]  ;;  %v311_v61 = vunpack.c.l.bf16 %v193_v53 }
  0x71   : > { %2761 = vmatpush.bf16.msra.mxu3 %v4372_v63  ;;  %v4406_v63 = vld [vmem:[%s4633_s22 + $0x3d8] sm:$0xff]  ;;  %v4439_v59 = vld [vmem:[%s4633_s22 + $0x4e0] sm:$0xff] }
  0x72   : > { %2705 = vmatpush.bf16.msra.mxu0 %v4347_v8  ;;  %v500_v3 = vpack.c.bf16 %v436_v57, %v404_v56  ;;  %v4396_v8 = vld [vmem:[%s4633_s22 + $0x388] sm:$0xff]  ;;  %v194_v56 = vld [vmem:[%s5138_s0 + $0x1b8] sm:$0x11]  ;;  %v4415_v57 = vld [vmem:[%s4633_s22 + $0x420] sm:$0xff] }
  0x73   : > { %2724 = vmatpush.bf16.msra.mxu1 %v4355_v11  ;;  %v161_v11 = vld [vmem:[%s5138_s0 + $0xb0] sm:$0xff] }
  0x74   : > { %2743 = vmatpush.bf16.msra.mxu2 %v4363_v0  ;;  %v4397_v0 = vld [vmem:[%s4633_s22 + $0x390] sm:$0xff]  ;;  %v247_v19 = vunpack.c.l.bf16 %v161_v11 }
  0x75   : > { %2762 = vmatpush.bf16.msra.mxu3 %v4371_v12  ;;  %2706 = vmatmul.bf16.vlgmr.msra.gmra.mxu0 %v467_v25  ;;  %v4380_v12 = vld [vmem:[%s4633_s22 + $0x308] sm:$0xff]  ;;  %v4426_v25 = vld [vmem:[%s4633_s22 + $0x478] sm:$0xff] }
  0x76   : > { %2774 = vmatpush.bf16.msrb.mxu0 %v4386_v15  ;;  %2725 = vmatmul.bf16.vlgmr.msra.gmra.mxu1 %v468_v27  ;;  %v4404_v15 = vld [vmem:[%s4633_s22 + $0x3c8] sm:$0xff]  ;;  %v218_v27 = vunpack.c.h.bf16 %v146_v13 }
  0x77   : > { %2793 = vmatpush.bf16.msrb.mxu1 %v4394_v16  ;;  %2744 = vmatmul.bf16.vlgmr.msra.gmra.mxu2 %v469_v28  ;;  %v4395_v16 = vld [vmem:[%s4633_s22 + $0x380] sm:$0xff]  ;;  %v250_v28 = vunpack.c.h.bf16 %v162_v14 }
  0x78   : > { %2812 = vmatpush.bf16.msrb.mxu2 %v4402_v7  ;;  %2763 = vmatmul.bf16.vlgmr.msra.gmra.mxu3 %v470_v29  ;;  %v4405_v7 = vld [vmem:[%s4633_s22 + $0x3d0] sm:$0xff]  ;;  %v4403_v29 = vld [vmem:[%s4633_s22 + $0x3c0] sm:$0xff] }
  0x79   : > { %2831 = vmatpush.bf16.msrb.mxu3 %v4410_v21  ;;  %v216_v21 = vunpack.c.h.bf16 %v145_v10 }
  0x7a   : > { %2775 = vmatpush.bf16.msrb.mxu0 %v4385_v30  ;;  %v4418_v30 = vld [vmem:[%s4633_s22 + $0x438] sm:$0xff] }
  0x7b   : > { %2794 = vmatpush.bf16.msrb.mxu1 %v4393_v26  ;;  %v4379_v26 = vld [vmem:[%s4633_s22 + $0x300] sm:$0xff]  ;;  %v344_v35 = vmax.f32 %v216_v21, 0.0 }
  0x7c   : > { %2813 = vmatpush.bf16.msrb.mxu2 %v4401_v22  ;;  %v248_v22 = vunpack.c.h.bf16 %v161_v11 }
  0x7d   : > { %2832 = vmatpush.bf16.msrb.mxu3 %v4409_v31  ;;  %v343_v31 = vmax.f32 %v215_v18, 0.0  ;;  %v4421_v18 = vld [vmem:[%s4633_s22 + $0x450] sm:$0xff] }
  0x7e   : > { %2776 = vmatpush.bf16.msrb.mxu0 %v4384_v36  ;;  %v376_v36 = vmax.f32 %v248_v22, 0.0 }
  0x7f   : > { %2795 = vmatpush.bf16.msrb.mxu1 %v4392_v33  ;;  %v4442_v33 = vld [vmem:[%s4633_s22 + $0x4f8] sm:$0xff] }
  0x80   : > { %2814 = vmatpush.bf16.msrb.mxu2 %v4400_v32  ;;  %v375_v32 = vmax.f32 %v247_v19, 0.0  ;;  %v472_v45 = vpack.c.bf16 %v376_v36, %v344_v35  ;;  %v4435_v35 = vld [vmem:[%s4633_s22 + $0x4c0] sm:$0xff] }
  0x81   : > { %2833 = vmatpush.bf16.msrb.mxu3 %v4408_v39  ;;  %v4425_v39 = vld [vmem:[%s4633_s22 + $0x470] sm:$0xff] }
  0x82   : > { %2777 = vmatpush.bf16.msrb.mxu0 %v4383_v48  ;;  %v471_v43 = vpack.c.bf16 %v375_v32, %v343_v31  ;;  %v4432_v48 = vld [vmem:[%s4633_s22 + $0x4a8] sm:$0xff] }
  0x83   : > { %2796 = vmatpush.bf16.msrb.mxu1 %v4391_v41  ;;  %v378_v41 = vmax.f32 %v250_v28, 0.0  ;;  %v147_v28 = vld [vmem:[%s5138_s0 + $0x40] sm:$0xff]  ;;  %v148_v31 = vld [vmem:[%s5138_s0 + $0x48] sm:$0xff] }
  0x84   : > { %2815 = vmatpush.bf16.msrb.mxu2 %v4399_v40  ;;  %v346_v40 = vmax.f32 %v218_v27, 0.0  ;;  %v4436_v27 = vld [vmem:[%s4633_s22 + $0x4c8] sm:$0xff]  ;;  %v219_v36 = vunpack.c.l.bf16 %v147_v28 }
  0x85   : > { %2834 = vmatpush.bf16.msrb.mxu3 %v4407_v51  ;;  %2711 = vmatmul.bf16.gmra.mxu0 %v499_v1  ;;  %v4440_v51 = vld [vmem:[%s4633_s22 + $0x4e8] sm:$0xff]  ;;  %v313_v1 = vunpack.c.l.bf16 %v194_v56 }
  0x86   : > { %2778 = vmatpush.bf16.msrb.mxu0 %v4382_v62  ;;  %2730 = vmatmul.bf16.gmra.mxu1 %v500_v3  ;;  %v474_v47 = vpack.c.bf16 %v378_v41, %v346_v40  ;;  %v314_v3 = vunpack.c.h.bf16 %v194_v56  ;;  %v164_v32 = vld [vmem:[%s5138_s0 + $0xc8] sm:$0xff]  ;;  %v221_v41 = vunpack.c.l.bf16 %v148_v31  ;;  %v4457_v56 = vld [vmem:[%s4633_s22 + $0x570] sm:$0xff] }
  0x87   : > { %2797 = vmatpush.bf16.msrb.mxu1 %v4390_v55  ;;  %2749 = vmatmul.bf16.gmra.mxu2 %v501_v4  ;;  %v178_v55 = vld [vmem:[%s5138_s0 + $0x138] sm:$0xff]  ;;  %v441_v13 = vmax.f32 %v313_v1, 0.0 }
  0x88   : > { %2816 = vmatpush.bf16.msrb.mxu2 %v4398_v52  ;;  %2768 = vmatmul.bf16.gmra.mxu3 %v502_v5  ;;  %v177_v52 = vld [vmem:[%s5138_s0 + $0x130] sm:$0xff]  ;;  %v4430_v4 = vld [vmem:[%s4633_s22 + $0x498] sm:$0xff] }
  0x89   : > { %2835 = vmatpush.bf16.msrb.mxu3 %v4406_v63  ;;  %v279_v60 = vunpack.c.l.bf16 %v177_v52  ;;  %v280_v62 = vunpack.c.h.bf16 %v177_v52  ;;  %v312_v63 = vunpack.c.h.bf16 %v193_v53  ;;  %v4414_v5 = vld [vmem:[%s4633_s22 + $0x418] sm:$0xff]  ;;  %v349_v53 = vmax.f32 %v221_v41, 0.0 }
  0x8a   : > { %2779 = vmatpush.bf16.msrb.mxu0 %v4381_v6  ;;  %v4422_v6 = vld [vmem:[%s4633_s22 + $0x458] sm:$0xff] }
  0x8b   : > { %2798 = vmatpush.bf16.msrb.mxu1 %v4389_v2  ;;  %v282_v2 = vunpack.c.h.bf16 %v178_v55  ;;  %v408_v10 = vmax.f32 %v280_v62, 0.0  ;;  %v440_v11 = vmax.f32 %v312_v63, 0.0 }
  0x8c   : > { %2817 = vmatpush.bf16.msrb.mxu2 %v4397_v0  ;;  %v281_v0 = vunpack.c.l.bf16 %v178_v55  ;;  %v4449_v55 = vld [vmem:[%s4633_s22 + $0x530] sm:$0xff] }
  0x8d   : > { %2836 = vmatpush.bf16.msrb.mxu3 %v4405_v7  ;;  %v407_v7 = vmax.f32 %v279_v60, 0.0  ;;  %v410_v14 = vmax.f32 %v282_v2, 0.0  ;;  %v504_v21 = vpack.c.bf16 %v440_v11, %v408_v10  ;;  %v4447_v10 = vld [vmem:[%s4633_s22 + $0x520] sm:$0xff]  ;;  %v180_v11 = vld [vmem:[%s5138_s0 + $0x148] sm:$0xff] }
  0x8e   : > { %2780 = vmatpush.bf16.msrb.mxu0 %v4380_v12  ;;  %v409_v12 = vmax.f32 %v281_v0, 0.0 }
  0x8f   : > { %2799 = vmatpush.bf16.msrb.mxu1 %v4388_v9  ;;  %v4438_v9 = vld [vmem:[%s4633_s22 + $0x4d8] sm:$0xff] }
  0x90   : > { %2818 = vmatpush.bf16.msrb.mxu2 %v4396_v8  ;;  %v439_v8 = vmax.f32 %v311_v61, 0.0  ;;  %v505_v22 = vpack.c.bf16 %v441_v13, %v409_v12  ;;  %v4464_v61 = vld [vmem:[%s4633_s22 + $0x5a8] sm:$0xff]  ;;  %v4455_v13 = vld [vmem:[%s4633_s22 + $0x560] sm:$0xff] }
  0x91   : > { %2837 = vmatpush.bf16.msrb.mxu3 %v4404_v15  ;;  %v442_v15 = vmax.f32 %v314_v3, 0.0  ;;  %v196_v12 = vld [vmem:[%s5138_s0 + $0x1c8] sm:$0x11] }
  0x92   : > { %2781 = vmatpush.bf16.msrb.mxu0 %v4379_v26  ;;  %v503_v19 = vpack.c.bf16 %v439_v8, %v407_v7  ;;  %v4420_v26 = vld [vmem:[%s4633_s22 + $0x448] sm:$0xff]  ;;  %v4463_v7 = vld [vmem:[%s4633_s22 + $0x5a0] sm:$0xff] }
  0x93   : > { %2800 = vmatpush.bf16.msrb.mxu1 %v4387_v17  ;;  %v4413_v17 = vld [vmem:[%s4633_s22 + $0x410] sm:$0xff]  ;;  %v506_v23 = vpack.c.bf16 %v442_v15, %v410_v14  ;;  %v179_v8 = vld [vmem:[%s5138_s0 + $0x140] sm:$0xff] }
  0x94   : > { %2819 = vmatpush.bf16.msrb.mxu2 %v4395_v16  ;;  %v4429_v16 = vld [vmem:[%s4633_s22 + $0x490] sm:$0xff]  ;;  %v4471_v14 = vld [vmem:[%s4633_s22 + $0x5e0] sm:$0xff] }
  0x95   : > { %2838 = vmatpush.bf16.msrb.mxu3 %v4403_v29  ;;  %2782 = vmatmul.bf16.vlgmr.msrb.gmra.mxu0 %v471_v43  ;;  %v163_v29 = vld [vmem:[%s5138_s0 + $0xc0] sm:$0xff]  ;;  %v4450_v43 = vld [vmem:[%s4633_s22 + $0x538] sm:$0xff] }
  0x96   : > { %2850 = vmatpush.bf16.msra.mxu0 %v4418_v30  ;;  %2801 = vmatmul.bf16.vlgmr.msrb.gmra.mxu1 %v472_v45  ;;  %v4427_v30 = vld [vmem:[%s4633_s22 + $0x480] sm:$0xff]  ;;  %v251_v37 = vunpack.c.l.bf16 %v163_v29  ;;  %v252_v40 = vunpack.c.h.bf16 %v163_v29  ;;  %v222_v45 = vunpack.c.h.bf16 %v148_v31  ;;  %v318_v29 = vunpack.c.h.bf16 %v196_v12 }
  0x97   : > { %2869 = vmatpush.bf16.msra.mxu1 %v4426_v25  ;;  %2820 = vmatmul.bf16.vlgmr.msrb.gmra.mxu2 %v473_v46  ;;  %v4412_v25 = vld [vmem:[%s4633_s22 + $0x408] sm:$0xff]  ;;  %v254_v46 = vunpack.c.h.bf16 %v164_v32 }
  0x98   : > { %2888 = vmatpush.bf16.msra.mxu2 %v4434_v20  ;;  %2839 = vmatmul.bf16.vlgmr.msrb.gmra.mxu3 %v474_v47  ;;  %v4437_v20 = vld [vmem:[%s4633_s22 + $0x4d0] sm:$0xff]  ;;  %v4474_v47 = vld [vmem:[%s4633_s22 + $0x5f8] sm:$0xff]  ;;  %v380_v52 = vmax.f32 %v252_v40, 0.0 }
  0x99   : > { %2907 = vmatpush.bf16.msra.mxu3 %v4442_v33  ;;  %v4411_v33 = vld [vmem:[%s4633_s22 + $0x400] sm:$0xff] }
  0x9a   : > { %2851 = vmatpush.bf16.msra.mxu0 %v4417_v42  ;;  %v253_v42 = vunpack.c.l.bf16 %v164_v32  ;;  %v4454_v32 = vld [vmem:[%s4633_s22 + $0x558] sm:$0xff] }
  0x9b   : > { %2870 = vmatpush.bf16.msra.mxu1 %v4425_v39  ;;  %v220_v39 = vunpack.c.h.bf16 %v147_v28  ;;  %v286_v28 = vunpack.c.h.bf16 %v180_v11 }
  0x9c   : > { %2889 = vmatpush.bf16.msra.mxu2 %v4433_v34  ;;  %v4419_v34 = vld [vmem:[%s4633_s22 + $0x440] sm:$0xff] }
  0x9d   : > { %2908 = vmatpush.bf16.msra.mxu3 %v4441_v44  ;;  %v4458_v44 = vld [vmem:[%s4633_s22 + $0x578] sm:$0xff]  ;;  %v414_v41 = vmax.f32 %v286_v28, 0.0  ;;  %v4489_v28 = vld [vmem:[%s4633_s22 + $0x670] sm:$0xff] }
  0x9e   : > { %2852 = vmatpush.bf16.msra.mxu0 %v4416_v49  ;;  %v379_v49 = vmax.f32 %v251_v37, 0.0 }
  0x9f   : > { %2871 = vmatpush.bf16.msra.mxu1 %v4424_v50  ;;  %v4465_v50 = vld [vmem:[%s4633_s22 + $0x5b0] sm:$0xff] }
  0xa0   : > { %2890 = vmatpush.bf16.msra.mxu2 %v4432_v48  ;;  %v347_v48 = vmax.f32 %v219_v36, 0.0  ;;  %v4461_v36 = vld [vmem:[%s4633_s22 + $0x590] sm:$0xff] }
  0xa1   : > { %2909 = vmatpush.bf16.msra.mxu3 %v4440_v51  ;;  %v348_v51 = vmax.f32 %v220_v39, 0.0 }
  0xa2   : > { %2853 = vmatpush.bf16.msra.mxu0 %v4415_v57  ;;  %v350_v57 = vmax.f32 %v222_v45, 0.0  ;;  %v475_v60 = vpack.c.bf16 %v379_v49, %v347_v48  ;;  %v4469_v45 = vld [vmem:[%s4633_s22 + $0x5d0] sm:$0xff]  ;;  %v4460_v49 = vld [vmem:[%s4633_s22 + $0x588] sm:$0xff] }
  0xa3   : > { %2872 = vmatpush.bf16.msra.mxu1 %v4423_v58  ;;  %v382_v58 = vmax.f32 %v254_v46, 0.0  ;;  %v476_v0 = vpack.c.bf16 %v380_v52, %v348_v51 }
  0xa4   : > { %2891 = vmatpush.bf16.msra.mxu2 %v4431_v54  ;;  %v381_v54 = vmax.f32 %v253_v42, 0.0  ;;  %v446_v42 = vmax.f32 %v318_v29, 0.0 }
  0xa5   : > { %2910 = vmatpush.bf16.msra.mxu3 %v4439_v59  ;;  %2787 = vmatmul.bf16.gmra.mxu0 %v503_v19  ;;  %v4473_v59 = vld [vmem:[%s4633_s22 + $0x5f0] sm:$0xff]  ;;  %v478_v3 = vpack.c.bf16 %v382_v58, %v350_v57  ;;  %v284_v19 = vunpack.c.h.bf16 %v179_v8  ;;  %v4444_v57 = vld [vmem:[%s4633_s22 + $0x508] sm:$0xff] }
  0xa6   : > { %2854 = vmatpush.bf16.msra.mxu0 %v4414_v5  ;;  %2806 = vmatmul.bf16.gmra.mxu1 %v504_v21  ;;  %v477_v1 = vpack.c.bf16 %v381_v54, %v349_v53  ;;  %v4456_v5 = vld [vmem:[%s4633_s22 + $0x568] sm:$0xff] }
  0xa7   : > { %2873 = vmatpush.bf16.msra.mxu1 %v4422_v6  ;;  %2825 = vmatmul.bf16.gmra.mxu2 %v505_v22  ;;  %v4472_v6 = vld [vmem:[%s4633_s22 + $0x5e8] sm:$0xff]  ;;  %v412_v37 = vmax.f32 %v284_v19, 0.0  ;;  %v4506_v19 = vld [vmem:[%s4633_s22 + $0x6f8] sm:$0xff] }
  0xa8   : > { %2892 = vmatpush.bf16.msra.mxu2 %v4430_v4  ;;  %2844 = vmatmul.bf16.gmra.mxu3 %v506_v23  ;;  %v4448_v4 = vld [vmem:[%s4633_s22 + $0x528] sm:$0xff] }
  0xa9   : > { %2911 = vmatpush.bf16.msra.mxu3 %v4438_v9  ;;  %v195_v9 = vld [vmem:[%s5138_s0 + $0x1c0] sm:$0x11] }
  0xaa   : > { %2855 = vmatpush.bf16.msra.mxu0 %v4413_v17  ;;  %v283_v17 = vunpack.c.l.bf16 %v179_v8 }
  0xab   : > { %2874 = vmatpush.bf16.msra.mxu1 %v4421_v18  ;;  %v315_v18 = vunpack.c.l.bf16 %v195_v9 }
  0xac   : > { %2893 = vmatpush.bf16.msra.mxu2 %v4429_v16 }
  0xad   : > { %2912 = vmatpush.bf16.msra.mxu3 %v4437_v20  ;;  %v4462_v20 = vld [vmem:[%s4633_s22 + $0x598] sm:$0xff] }
  0xae   : > { %2856 = vmatpush.bf16.msra.mxu0 %v4412_v25  ;;  %v285_v25 = vunpack.c.l.bf16 %v180_v11  ;;  %v4482_v11 = vld [vmem:[%s4633_s22 + $0x638] sm:$0xff] }
  0xaf   : > { %2875 = vmatpush.bf16.msra.mxu1 %v4420_v26  ;;  %v317_v26 = vunpack.c.l.bf16 %v196_v12  ;;  %v4490_v12 = vld [vmem:[%s4633_s22 + $0x678] sm:$0xff] }
  0xb0   : > { %2894 = vmatpush.bf16.msra.mxu2 %v4428_v24  ;;  %v316_v24 = vunpack.c.h.bf16 %v195_v9  ;;  %v413_v39 = vmax.f32 %v285_v25, 0.0 }
  0xb1   : > { %2913 = vmatpush.bf16.msra.mxu3 %v4436_v27  ;;  %v445_v40 = vmax.f32 %v317_v26, 0.0 }
  0xb2   : > { %2857 = vmatpush.bf16.msra.mxu0 %v4411_v33  ;;  %v2555_v62 = vpop.f32.mrf.mxu0  ;;  %v4470_v33 = vld [vmem:[%s4633_s22 + $0x5d8] sm:$0xff] }
  0xb3   : > { %2876 = vmatpush.bf16.msra.mxu1 %v4419_v34  ;;  %v2574_v63 = vpop.f32.mrf.mxu1  ;;  %v411_v34 = vmax.f32 %v283_v17, 0.0  ;;  %v509_v54 = vpack.c.bf16 %v445_v40, %v413_v39 }
  0xb4   : > { %2895 = vmatpush.bf16.msra.mxu2 %v4427_v30  ;;  %v2575_v2 = vadd.f32 %v2574_v63, %v2555_v62  ;;  %v4446_v30 = vld [vmem:[%s4633_s22 + $0x518] sm:$0xff]  ;;  %v149_v62 = vld [vmem:[%s5138_s0 + $0x50] sm:$0xff] }
  0xb5   : > { %2914 = vmatpush.bf16.msra.mxu3 %v4435_v35  ;;  %2858 = vmatmul.bf16.vlgmr.msra.gmra.mxu0 %v475_v60  ;;  %v443_v35 = vmax.f32 %v315_v18, 0.0  ;;  %v4468_v60 = vld [vmem:[%s4633_s22 + $0x5c8] sm:$0xff]  ;;  %v165_v63 = vld [vmem:[%s5138_s0 + $0xd0] sm:$0xff]  ;;  %v223_v8 = vunpack.c.l.bf16 %v149_v62 }
  0xb6   : > { %2926 = vmatpush.bf16.msrb.mxu0 %v4450_v43  ;;  %2877 = vmatmul.bf16.vlgmr.msra.gmra.mxu1 %v476_v0  ;;  %v4445_v43 = vld [vmem:[%s4633_s22 + $0x510] sm:$0xff]  ;;  %v4498_v0 = vld [vmem:[%s4633_s22 + $0x6b8] sm:$0xff]  ;;  %v255_v9 = vunpack.c.l.bf16 %v165_v63 }
  0xb7   : > { %2945 = vmatpush.bf16.msrb.mxu1 %v4458_v44  ;;  %2896 = vmatmul.bf16.vlgmr.msra.gmra.mxu2 %v477_v1  ;;  %v4453_v44 = vld [vmem:[%s4633_s22 + $0x550] sm:$0xff]  ;;  %v507_v48 = vpack.c.bf16 %v443_v35, %v411_v34  ;;  %v4443_v1 = vld [vmem:[%s4633_s22 + $0x500] sm:$0xff]  ;;  %v351_v25 = vmax.f32 %v223_v8, 0.0  ;;  %v4496_v35 = vld [vmem:[%s4633_s22 + $0x6a8] sm:$0xff] }
  0xb8   : > { %2964 = vmatpush.bf16.msrb.mxu2 %v4466_v38  ;;  %2915 = vmatmul.bf16.vlgmr.msra.gmra.mxu3 %v478_v3  ;;  %v444_v38 = vmax.f32 %v316_v24, 0.0  ;;  %v166_v3 = vld [vmem:[%s5138_s0 + $0xd8] sm:$0xff]  ;;  %v383_v26 = vmax.f32 %v255_v9, 0.0  ;;  %v4505_v34 = vld [vmem:[%s4633_s22 + $0x6f0] sm:$0xff] }
  0xb9   : > { %2983 = vmatpush.bf16.msrb.mxu3 %v4474_v47  ;;  %v257_v18 = vunpack.c.l.bf16 %v166_v3 }
  0xba   : > { %2927 = vmatpush.bf16.msrb.mxu0 %v4449_v55  ;;  %v2593_v15 = vpop.f32.mrf.mxu2  ;;  %v2557_v22 = vpop.f32.mrf.mxu0  ;;  %v508_v53 = vpack.c.bf16 %v444_v38, %v412_v37  ;;  %v479_v40 = vpack.c.bf16 %v383_v26, %v351_v25 }
  0xbb   : > { %2946 = vmatpush.bf16.msrb.mxu1 %v4457_v56  ;;  %v2612_v16 = vpop.f32.mrf.mxu3  ;;  %v2594_v21 = vadd.f32 %v2593_v15, %v2575_v2  ;;  %v2576_v23 = vpop.f32.mrf.mxu1  ;;  %v510_v56 = vpack.c.bf16 %v446_v42, %v414_v41  ;;  %v150_v2 = vld [vmem:[%s5138_s0 + $0x58] sm:$0xff]  ;;  %v4488_v41 = vld [vmem:[%s4633_s22 + $0x668] sm:$0xff] }
  0xbc   : > { %2965 = vmatpush.bf16.msrb.mxu2 %v4465_v50  ;;  %v2577_v27 = vadd.f32 %v2576_v23, %v2557_v22  ;;  %v225_v17 = vunpack.c.l.bf16 %v150_v2  ;;  %v226_v22 = vunpack.c.h.bf16 %v150_v2  ;;  %v258_v23 = vunpack.c.h.bf16 %v166_v3  ;;  %v4486_v2 = vld [vmem:[%s4633_s22 + $0x658] sm:$0xff] }
  0xbd   : > { %2984 = vmatpush.bf16.msrb.mxu3 %v4473_v59  ;;  %v4933_v31 = vadd.f32 %v2612_v16, %v2594_v21  ;;  %v4452_v59 = vld [vmem:[%s4633_s22 + $0x548] sm:$0xff]  ;;  %v256_v16 = vunpack.c.h.bf16 %v165_v63 }
  0xbe   : > { %2928 = vmatpush.bf16.msrb.mxu0 %v4448_v4  ;;  %v4451_v4 = vld [vmem:[%s4633_s22 + $0x540] sm:$0xff]  ;;  %v386_v37 = vmax.f32 %v258_v23, 0.0 }
  0xbf   : > { %2947 = vmatpush.bf16.msrb.mxu1 %v4456_v5  ;;  %v4467_v5 = vld [vmem:[%s4633_s22 + $0x5c0] sm:$0xff] }
  0xc0   : > { %2966 = vmatpush.bf16.msrb.mxu2 %v4464_v61  ;;  %v4459_v61 = vld [vmem:[%s4633_s22 + $0x580] sm:$0xff] }
  0xc1   : > { %2985 = vmatpush.bf16.msrb.mxu3 %v4472_v6 }
  0xc2   : > { %2929 = vmatpush.bf16.msrb.mxu0 %v4447_v10  ;;  %v2595_v46 = vpop.f32.mrf.mxu2  ;;  %v2560_v51 = vpop.f32.mrf.mxu0  ;;  %v224_v10 = vunpack.c.h.bf16 %v149_v62 }
  0xc3   : > { %2948 = vmatpush.bf16.msrb.mxu1 %v4455_v13  ;;  %v2614_v47 = vpop.f32.mrf.mxu3  ;;  %v2596_v50 = vadd.f32 %v2595_v46, %v2577_v27  ;;  %v2579_v52 = vpop.f32.mrf.mxu1  ;;  %v4481_v27 = vld [vmem:[%s4633_s22 + $0x630] sm:$0xff] }
  0xc4   : > { %2967 = vmatpush.bf16.msrb.mxu2 %v4463_v7  ;;  %v2580_v55 = vadd.f32 %v2579_v52, %v2560_v51  ;;  %v352_v29 = vmax.f32 %v224_v10, 0.0  ;;  %v4504_v51 = vld [vmem:[%s4633_s22 + $0x6e8] sm:$0xff]  ;;  %v4495_v52 = vld [vmem:[%s4633_s22 + $0x6a0] sm:$0xff] }
  0xc5   : > { %2986 = vmatpush.bf16.msrb.mxu3 %v4471_v14  ;;  %v4943_v58 = vadd.f32 %v2614_v47, %v2596_v50  ;;  %2863 = vmatmul.bf16.gmra.mxu0 %v507_v48 }
  0xc6   : > { %2930 = vmatpush.bf16.msrb.mxu0 %v4446_v30  ;;  %2882 = vmatmul.bf16.gmra.mxu1 %v508_v53  ;;  %v384_v30 = vmax.f32 %v256_v16, 0.0  ;;  %v4493_v16 = vld [vmem:[%s4633_s22 + $0x690] sm:$0xff] }
  0xc7   : > { %2949 = vmatpush.bf16.msrb.mxu1 %v4454_v32  ;;  %2901 = vmatmul.bf16.gmra.mxu2 %v509_v54  ;;  %v353_v32 = vmax.f32 %v225_v17, 0.0  ;;  %v4487_v54 = vld [vmem:[%s4633_s22 + $0x660] sm:$0xff] }
  0xc8   : > { %2968 = vmatpush.bf16.msrb.mxu2 %v4462_v20  ;;  %2920 = vmatmul.bf16.gmra.mxu3 %v510_v56  ;;  %v4497_v20 = vld [vmem:[%s4633_s22 + $0x6b0] sm:$0xff]  ;;  %v4479_v56 = vld [vmem:[%s4633_s22 + $0x620] sm:$0xff] }
  0xc9   : > { %2987 = vmatpush.bf16.msrb.mxu3 %v4470_v33  ;;  %v385_v33 = vmax.f32 %v257_v18, 0.0 }
  0xca   : > { %2931 = vmatpush.bf16.msrb.mxu0 %v4445_v43  ;;  %v2598_v6 = vpop.f32.mrf.mxu2  ;;  %v2562_v14 = vpop.f32.mrf.mxu0 }
  0xcb   : > { %2950 = vmatpush.bf16.msrb.mxu1 %v4453_v44  ;;  %v2617_v7 = vpop.f32.mrf.mxu3  ;;  %v2599_v13 = vadd.f32 %v2598_v6, %v2580_v55  ;;  %v2581_v15 = vpop.f32.mrf.mxu1  ;;  %v480_v44 = vpack.c.bf16 %v384_v30, %v352_v29  ;;  %v197_v55 = vld [vmem:[%s5138_s0 + $0x1d0] sm:$0x11]  ;;  %v4492_v29 = vld [vmem:[%s4633_s22 + $0x688] sm:$0xff] }
  0xcc   : > { %2969 = vmatpush.bf16.msrb.mxu2 %v4461_v36  ;;  %v2582_v21 = vadd.f32 %v2581_v15, %v2562_v14  ;;  %v354_v36 = vmax.f32 %v226_v22, 0.0  ;;  %v320_v6 = vunpack.c.h.bf16 %v197_v55  ;;  %v4502_v15 = vld [vmem:[%s4633_s22 + $0x6d8] sm:$0xff] }
  0xcd   : > { %2988 = vmatpush.bf16.msrb.mxu3 %v4469_v45  ;;  %v4968_v24 = vadd.f32 %v2617_v7, %v2599_v13  ;;  %v481_v45 = vpack.c.bf16 %v385_v33, %v353_v32  ;;  %v4478_v13 = vld [vmem:[%s4633_s22 + $0x618] sm:$0xff]  ;;  %v4484_v33 = vld [vmem:[%s4633_s22 + $0x648] sm:$0xff] }
  0xce   : > { %2932 = vmatpush.bf16.msrb.mxu0 %v4444_v57  ;;  %v482_v48 = vpack.c.bf16 %v386_v37, %v354_v36  ;;  %v182_v57 = vld [vmem:[%s5138_s0 + $0x158] sm:$0xff] }
  0xcf   : > { %2951 = vmatpush.bf16.msrb.mxu1 %v4452_v59  ;;  %v198_v59 = vld [vmem:[%s5138_s0 + $0x1d8] sm:$0x11]  ;;  %v289_v7 = vunpack.c.l.bf16 %v182_v57 }
  0xd0   : > { %2970 = vmatpush.bf16.msrb.mxu2 %v4460_v49  ;;  %v4480_v49 = vld [vmem:[%s4633_s22 + $0x628] sm:$0xff]  ;;  %v321_v8 = vunpack.c.l.bf16 %v198_v59 }
  0xd1   : > { %2989 = vmatpush.bf16.msrb.mxu3 %v4468_v60  ;;  %v4503_v60 = vld [vmem:[%s4633_s22 + $0x6e0] sm:$0xff]  ;;  %v417_v22 = vmax.f32 %v289_v7, 0.0 }
  0xd2   : > { %2933 = vmatpush.bf16.msrb.mxu0 %v4443_v1  ;;  %v2600_v38 = vpop.f32.mrf.mxu2  ;;  %v2631_v43 = vpop.f32.mrf.mxu0  ;;  %v449_v23 = vmax.f32 %v321_v8, 0.0 }
  0xd3   : > { %2952 = vmatpush.bf16.msrb.mxu1 %v4451_v4  ;;  %v2619_v39 = vpop.f32.mrf.mxu3  ;;  %v2601_v42 = vadd.f32 %v2600_v38, %v2582_v21  ;;  %v2632_v46 = vadd.f32 %v2631_v43, %v4933_v31  ;;  %v2650_v47 = vpop.f32.mrf.mxu1  ;;  %v181_v31 = vld [vmem:[%s5138_s0 + $0x150] sm:$0xff]  ;;  %v448_v21 = vmax.f32 %v320_v6, 0.0 }
  0xd4   : > { %2971 = vmatpush.bf16.msrb.mxu2 %v4459_v61  ;;  %v4494_v61 = vld [vmem:[%s4633_s22 + $0x698] sm:$0xff]  ;;  %v287_v63 = vunpack.c.l.bf16 %v181_v31  ;;  %v288_v1 = vunpack.c.h.bf16 %v181_v31  ;;  %v513_v38 = vpack.c.bf16 %v449_v23, %v417_v22  ;;  %v4499_v31 = vld [vmem:[%s4633_s22 + $0x6c0] sm:$0xff]  ;;  %v4512_v23 = vld [vmem:[%s4633_s22 + $0x728] sm:$0xff] }
  0xd5   : > { %2990 = vmatpush.bf16.msrb.mxu3 %v4467_v5  ;;  %v4977_v50 = vadd.f32 %v2619_v39, %v2601_v42  ;;  %v2651_v53 = vadd.f32 %v2650_v47, %v2632_v46  ;;  %2934 = vmatmul.bf16.vlgmr.msrb.gmra.mxu0 %v479_v40  ;;  %v4476_v42 = vld [vmem:[%s4633_s22 + $0x608] sm:$0xff]  ;;  %v4483_v47 = vld [vmem:[%s4633_s22 + $0x640] sm:$0xff] }
  0xd6   : > { %3002 = vmatpush.bf16.msra.mxu0 %v4482_v11  ;;  %2953 = vmatmul.bf16.vlgmr.msrb.gmra.mxu1 %v480_v44  ;;  %v290_v11 = vunpack.c.h.bf16 %v182_v57  ;;  %v415_v18 = vmax.f32 %v287_v63, 0.0  ;;  %v4500_v44 = vld [vmem:[%s4633_s22 + $0x6c8] sm:$0xff] }
  0xd7   : > { %3021 = vmatpush.bf16.msra.mxu1 %v4490_v12  ;;  %2972 = vmatmul.bf16.vlgmr.msrb.gmra.mxu2 %v481_v45  ;;  %v322_v12 = vunpack.c.h.bf16 %v198_v59  ;;  %v4491_v45 = vld [vmem:[%s4633_s22 + $0x680] sm:$0xff] }
  0xd8   : > { %3040 = vmatpush.bf16.msra.mxu2 %v4498_v0  ;;  %2991 = vmatmul.bf16.vlgmr.msrb.gmra.mxu3 %v482_v48  ;;  %v319_v0 = vunpack.c.l.bf16 %v197_v55  ;;  %v418_v25 = vmax.f32 %v290_v11, 0.0  ;;  %v4530_v48 = vld [vmem:[%s4633_s22 + $0x7b8] sm:$0xff]  ;;  %v4513_v11 = vld [vmem:[%s4633_s22 + $0x730] sm:$0xff] }
  0xd9   : > { %3059 = vmatpush.bf16.msra.mxu3 %v4506_v19  ;;  %v450_v26 = vmax.f32 %v322_v12, 0.0  ;;  %v4514_v55 = vld [vmem:[%s4633_s22 + $0x738] sm:$0xff] }
  0xda   : > { %3003 = vmatpush.bf16.msra.mxu0 %v4481_v27  ;;  %v2669_v62 = vpop.f32.mrf.mxu2  ;;  %v2633_v5 = vpop.f32.mrf.mxu0  ;;  %v447_v19 = vmax.f32 %v319_v0, 0.0  ;;  %v4477_v27 = vld [vmem:[%s4633_s22 + $0x610] sm:$0xff] }
  0xdb   : > { %3022 = vmatpush.bf16.msra.mxu1 %v4489_v28  ;;  %v2670_v3 = vadd.f32 %v2669_v62, %v2651_v53  ;;  %v2688_v4 = vpop.f32.mrf.mxu3  ;;  %v2634_v9 = vadd.f32 %v2633_v5, %v4943_v58  ;;  %v2652_v10 = vpop.f32.mrf.mxu1  ;;  %v416_v58 = vmax.f32 %v288_v1, 0.0  ;;  %v4501_v28 = vld [vmem:[%s4633_s22 + $0x6d0] sm:$0xff]  ;;  %v152_v53 = vld [vmem:[%s5138_s0 + $0x68] sm:$0xff] }
  0xdc   : > { %3041 = vmatpush.bf16.msra.mxu2 %v4497_v20  ;;  %v4485_v20 = vld [vmem:[%s4633_s22 + $0x650] sm:$0xff]  ;;  %v511_v32 = vpack.c.bf16 %v447_v19, %v415_v18  ;;  %v230_v8 = vunpack.c.h.bf16 %v152_v53 }
  0xdd   : > { %3060 = vmatpush.bf16.msra.mxu3 %v4505_v34  ;;  %v5000_v14 = vadd.f32 %v2688_v4, %v2670_v3  ;;  %v2653_v17 = vadd.f32 %v2652_v10, %v2634_v9  ;;  %v512_v37 = vpack.c.bf16 %v448_v21, %v416_v58  ;;  %v4529_v62 = vld [vmem:[%s4633_s22 + $0x7b0] sm:$0xff]  ;;  %v229_v3 = vunpack.c.l.bf16 %v152_v53  ;;  %v4520_v58 = vld [vmem:[%s4633_s22 + $0x768] sm:$0xff] }
  0xde   : > { %3004 = vmatpush.bf16.msra.mxu0 %v4480_v49  ;;  %v167_v49 = vld [vmem:[%s5138_s0 + $0xe0] sm:$0xff]  ;;  %v4521_v5 = vld [vmem:[%s4633_s22 + $0x770] sm:$0xff]  ;;  %v358_v21 = vmax.f32 %v230_v8, 0.0 }
  0xdf   : > { %3023 = vmatpush.bf16.msra.mxu1 %v4488_v41  ;;  %v514_v41 = vpack.c.bf16 %v450_v26, %v418_v25  ;;  %v259_v59 = vunpack.c.l.bf16 %v167_v49  ;;  %v357_v19 = vmax.f32 %v229_v3, 0.0  ;;  %v4509_v3 = vld [vmem:[%s4633_s22 + $0x710] sm:$0xff] }
  0xe0   : > { %3042 = vmatpush.bf16.msra.mxu2 %v4496_v35 }
  0xe1   : > { %3061 = vmatpush.bf16.msra.mxu3 %v4504_v51  ;;  %v4522_v51 = vld [vmem:[%s4633_s22 + $0x778] sm:$0xff] }
  0xe2   : > { %3005 = vmatpush.bf16.msra.mxu0 %v4479_v56  ;;  %v2671_v30 = vpop.f32.mrf.mxu2  ;;  %v2636_v36 = vpop.f32.mrf.mxu0 }
  0xe3   : > { %3024 = vmatpush.bf16.msra.mxu1 %v4487_v54  ;;  %v2672_v34 = vadd.f32 %v2671_v30, %v2653_v17  ;;  %v2690_v35 = vpop.f32.mrf.mxu3  ;;  %v2637_v39 = vadd.f32 %v2636_v36, %v4968_v24  ;;  %v2655_v40 = vpop.f32.mrf.mxu1  ;;  %v151_v24 = vld [vmem:[%s5138_s0 + $0x60] sm:$0xff]  ;;  %v168_v54 = vld [vmem:[%s5138_s0 + $0xe8] sm:$0xff]  ;;  %v4533_v17 = vld [vmem:[%s4633_s22 + $0x7d0] sm:$0xff] }
  0xe4   : > { %3043 = vmatpush.bf16.msra.mxu2 %v4495_v52  ;;  %v4475_v52 = vld [vmem:[%s4633_s22 + $0x600] sm:$0xff]  ;;  %v227_v57 = vunpack.c.l.bf16 %v151_v24  ;;  %v261_v4 = vunpack.c.l.bf16 %v168_v54  ;;  %v262_v9 = vunpack.c.h.bf16 %v168_v54  ;;  %v4525_v54 = vld [vmem:[%s4633_s22 + $0x790] sm:$0xff] }
  0xe5   : > { %3062 = vmatpush.bf16.msra.mxu3 %v4503_v60  ;;  %v5011_v43 = vadd.f32 %v2690_v35, %v2672_v34  ;;  %v2656_v46 = vadd.f32 %v2655_v40, %v2637_v39  ;;  %2939 = vmatmul.bf16.gmra.mxu0 %v511_v32  ;;  %v228_v60 = vunpack.c.h.bf16 %v151_v24  ;;  %v4511_v39 = vld [vmem:[%s4633_s22 + $0x720] sm:$0xff]  ;;  %v4532_v40 = vld [vmem:[%s4633_s22 + $0x7c8] sm:$0xff] }
  0xe6   : > { %3006 = vmatpush.bf16.msra.mxu0 %v4478_v13  ;;  %2958 = vmatmul.bf16.gmra.mxu1 %v512_v37  ;;  %v355_v13 = vmax.f32 %v227_v57, 0.0  ;;  %v390_v22 = vmax.f32 %v262_v9, 0.0  ;;  %v4519_v37 = vld [vmem:[%s4633_s22 + $0x760] sm:$0xff] }
  0xe7   : > { %3025 = vmatpush.bf16.msra.mxu1 %v4486_v2  ;;  %2977 = vmatmul.bf16.gmra.mxu2 %v513_v38  ;;  %v260_v2 = vunpack.c.h.bf16 %v167_v49  ;;  %v4531_v24 = vld [vmem:[%s4633_s22 + $0x7c0] sm:$0xff] }
  0xe8   : > { %3044 = vmatpush.bf16.msra.mxu2 %v4494_v61  ;;  %2996 = vmatmul.bf16.gmra.mxu3 %v514_v41  ;;  %v4534_v61 = vld [vmem:[%s4633_s22 + $0x7d8] sm:$0xff]  ;;  %v486_v36 = vpack.c.bf16 %v390_v22, %v358_v21 }
  0xe9   : > { %3063 = vmatpush.bf16.msra.mxu3 %v4502_v15  ;;  %v387_v15 = vmax.f32 %v259_v59, 0.0  ;;  %v388_v18 = vmax.f32 %v260_v2, 0.0 }
  0xea   : > { %3007 = vmatpush.bf16.msra.mxu0 %v4477_v27  ;;  %v2674_v56 = vpop.f32.mrf.mxu2  ;;  %v2638_v1 = vpop.f32.mrf.mxu0  ;;  %v4527_v27 = vld [vmem:[%s4633_s22 + $0x7a0] sm:$0xff] }
  0xeb   : > { %3026 = vmatpush.bf16.msra.mxu1 %v4485_v20  ;;  %v2675_v63 = vadd.f32 %v2674_v56, %v2656_v46  ;;  %v2693_v0 = vpop.f32.mrf.mxu3  ;;  %v2639_v6 = vadd.f32 %v2638_v1, %v4977_v50  ;;  %v2657_v7 = vpop.f32.mrf.mxu1  ;;  %v356_v50 = vmax.f32 %v228_v60, 0.0  ;;  %v389_v20 = vmax.f32 %v261_v4, 0.0  ;;  %v200_v46 = vld [vmem:[%s5138_s0 + $0x1e8] sm:$0x11]  ;;  %v4517_v1 = vld [vmem:[%s4633_s22 + $0x750] sm:$0xff] }
  0xec   : > { %3045 = vmatpush.bf16.msra.mxu2 %v4493_v16  ;;  %v4528_v16 = vld [vmem:[%s4633_s22 + $0x7a8] sm:$0xff]  ;;  %v483_v26 = vpack.c.bf16 %v387_v15, %v355_v13  ;;  %v325_v60 = vunpack.c.l.bf16 %v200_v46 }
  0xed   : > { %3064 = vmatpush.bf16.msra.mxu3 %v4501_v28  ;;  %v5037_v10 = vadd.f32 %v2693_v0, %v2675_v63  ;;  %v2658_v12 = vadd.f32 %v2657_v7, %v2639_v6  ;;  %v484_v32 = vpack.c.bf16 %v388_v18, %v356_v50  ;;  %v326_v0 = vunpack.c.h.bf16 %v200_v46  ;;  %v4524_v7 = vld [vmem:[%s4633_s22 + $0x788] sm:$0xff]  ;;  %v4523_v18 = vld [vmem:[%s4633_s22 + $0x780] sm:$0xff] }
  0xee   : > { %3008 = vmatpush.bf16.msra.mxu0 %v4476_v42  ;;  %v4526_v42 = vld [vmem:[%s4633_s22 + $0x798] sm:$0xff]  ;;  %v4516_v15 = vld [vmem:[%s4633_s22 + $0x748] sm:$0xff] }
  0xef   : > { %3027 = vmatpush.bf16.msra.mxu1 %v4484_v33  ;;  %v485_v33 = vpack.c.bf16 %v389_v20, %v357_v19  ;;  %v454_v13 = vmax.f32 %v326_v0, 0.0 }
  0xf0   : > { %3046 = vmatpush.bf16.msra.mxu2 %v4492_v29 }
  0xf1   : > { %3065 = vmatpush.bf16.msra.mxu3 %v4500_v44  ;;  %v199_v44 = vld [vmem:[%s5138_s0 + $0x1e0] sm:$0x11] }
  0xf2   : > { %3009 = vmatpush.bf16.msra.mxu0 %v4475_v52  ;;  %v2676_v25 = vpop.f32.mrf.mxu2  ;;  %v2707_v30 = vpop.f32.mrf.mxu0  ;;  %v323_v52 = vunpack.c.l.bf16 %v199_v44  ;;  %v324_v57 = vunpack.c.h.bf16 %v199_v44 }
  0xf3   : > { %3028 = vmatpush.bf16.msra.mxu1 %v4483_v47  ;;  %v2677_v28 = vadd.f32 %v2676_v25, %v2658_v12  ;;  %v2695_v29 = vpop.f32.mrf.mxu3  ;;  %v2708_v34 = vadd.f32 %v2707_v30, %v5000_v14  ;;  %v2726_v35 = vpop.f32.mrf.mxu1  ;;  %v183_v14 = vld [vmem:[%s5138_s0 + $0x160] sm:$0xff]  ;;  %v4518_v47 = vld [vmem:[%s4633_s22 + $0x758] sm:$0xff] }
  0xf4   : > { %3047 = vmatpush.bf16.msra.mxu2 %v4491_v45  ;;  %v184_v45 = vld [vmem:[%s5138_s0 + $0x168] sm:$0xff]  ;;  %v292_v53 = vunpack.c.h.bf16 %v183_v14  ;;  %v451_v6 = vmax.f32 %v323_v52, 0.0 }
  0xf5   : > { %3066 = vmatpush.bf16.msra.mxu3 %v4499_v31  ;;  %v5047_v38 = vadd.f32 %v2695_v29, %v2677_v28  ;;  %v2727_v41 = vadd.f32 %v2726_v35, %v2708_v34  ;;  %3010 = vmatmul.bf16.vlgmr.msra.gmra.mxu0 %v483_v26  ;;  %v293_v59 = vunpack.c.l.bf16 %v184_v45  ;;  %v294_v63 = vunpack.c.h.bf16 %v184_v45  ;;  %v4507_v29 = vld [vmem:[%s4633_s22 + $0x700] sm:$0xff]  ;;  %v170_v34 = vld [vmem:[%s5138_s0 + $0xf8] sm:$0xff] }
  0xf6   : > { %3078 = vmatpush.bf16.msrb.mxu0 %v4514_v55  ;;  %3029 = vmatmul.bf16.vlgmr.msra.gmra.mxu1 %v484_v32  ;;  %v420_v8 = vmax.f32 %v292_v53, 0.0  ;;  %v153_v32 = vld [vmem:[%s5138_s0 + $0x70] sm:$0xff]  ;;  %v265_v45 = vunpack.c.l.bf16 %v170_v34 }
  0xf7   : > { %3097 = vmatpush.bf16.msrb.mxu1 %v4522_v51  ;;  %3048 = vmatmul.bf16.vlgmr.msra.gmra.mxu2 %v485_v33  ;;  %v291_v51 = vunpack.c.l.bf16 %v183_v14  ;;  %v421_v9 = vmax.f32 %v293_v59, 0.0  ;;  %v422_v12 = vmax.f32 %v294_v63, 0.0  ;;  %v154_v33 = vld [vmem:[%s5138_s0 + $0x78] sm:$0xff] }
  0xf8   : > { %3116 = vmatpush.bf16.msrb.mxu2 %v4530_v48  ;;  %3067 = vmatmul.bf16.vlgmr.msra.gmra.mxu3 %v486_v36  ;;  %v4510_v48 = vld [vmem:[%s4633_s22 + $0x718] sm:$0xff]  ;;  %v231_v36 = vunpack.c.l.bf16 %v153_v32  ;;  %v233_v44 = vunpack.c.l.bf16 %v154_v33 }
  0xf9   : > { %3139 = vmatpush.bf16.msrb.mxu3 %v4534_v61  ;;  %v518_v26 = vpack.c.bf16 %v454_v13, %v422_v12 }
  0xfa   : > { %3079 = vmatpush.bf16.msrb.mxu0 %v4513_v11  ;;  %v2745_v49 = vpop.f32.mrf.mxu2  ;;  %v2709_v56 = vpop.f32.mrf.mxu0  ;;  %v453_v11 = vmax.f32 %v325_v60, 0.0  ;;  %v359_v52 = vmax.f32 %v231_v36, 0.0 }
  0xfb   : > { %3098 = vmatpush.bf16.msrb.mxu1 %v4521_v5  ;;  %v2746_v31 = vadd.f32 %v2745_v49, %v2727_v41  ;;  %v2764_v55 = vpop.f32.mrf.mxu3  ;;  %v2710_v61 = vadd.f32 %v2709_v56, %v5011_v43  ;;  %v419_v5 = vmax.f32 %v291_v51, 0.0  ;;  %v452_v43 = vmax.f32 %v324_v57, 0.0 }
  0xfc   : > { %3117 = vmatpush.bf16.msrb.mxu2 %v4529_v62  ;;  %v2728_v62 = vpop.f32.mrf.mxu1  ;;  %v517_v22 = vpack.c.bf16 %v453_v11, %v421_v9  ;;  %v393_v56 = vmax.f32 %v265_v45, 0.0  ;;  %v202_v9 = vld [vmem:[%s5138_s0 + $0x1f8] sm:$0x11] }
  0xfd   : > { %3140 = vmatpush.bf16.msrb.mxu3 %v4533_v17  ;;  %v5070_v2 = vadd.f32 %v2764_v55, %v2746_v31  ;;  %v2729_v4 = vadd.f32 %v2728_v62, %v2710_v61  ;;  %v515_v50 = vpack.c.bf16 %v451_v6, %v419_v5  ;;  %v516_v21 = vpack.c.bf16 %v452_v43, %v420_v8  ;;  %v185_v8 = vld [vmem:[%s5138_s0 + $0x170] sm:$0xff] }
  0xfe   : > { %3080 = vmatpush.bf16.msrb.mxu0 %v4512_v23  ;;  %v361_v55 = vmax.f32 %v233_v44, 0.0  ;;  %v201_v43 = vld [vmem:[%s5138_s0 + $0x1f0] sm:$0x11]  ;;  %v295_v12 = vunpack.c.l.bf16 %v185_v8 }
  0xff   : > { %3099 = vmatpush.bf16.msrb.mxu1 %v4520_v58  ;;  %v327_v13 = vunpack.c.l.bf16 %v201_v43 }
 0x100   : > { %3118 = vmatpush.bf16.msrb.mxu2 %v4528_v16  ;;  %v4508_v16 = vld [vmem:[%s4633_s22 + $0x708] sm:$0xff] }
 0x101   : > { %3141 = vmatpush.bf16.msrb.mxu3 %v4532_v40 }
 0x102   : > { %3081 = vmatpush.bf16.msrb.mxu0 %v4511_v39  ;;  %v2747_v17 = vpop.f32.mrf.mxu2  ;;  %v2712_v58 = vpop.f32.mrf.mxu0  ;;  %v232_v39 = vunpack.c.h.bf16 %v153_v32 }
 0x103   : > { %3100 = vmatpush.bf16.msrb.mxu1 %v4519_v37  ;;  %v2748_v19 = vadd.f32 %v2747_v17, %v2729_v4  ;;  %v2766_v20 = vpop.f32.mrf.mxu3  ;;  %v2713_v23 = vadd.f32 %v2712_v58, %v5037_v10  ;;  %v169_v10 = vld [vmem:[%s5138_s0 + $0xf0] sm:$0xff] }
 0x104   : > { %3119 = vmatpush.bf16.msrb.mxu2 %v4527_v27  ;;  %v2731_v25 = vpop.f32.mrf.mxu1  ;;  %v4515_v27 = vld [vmem:[%s4633_s22 + $0x740] sm:$0xff]  ;;  %v263_v37 = vunpack.c.l.bf16 %v169_v10  ;;  %v264_v14 = vunpack.c.h.bf16 %v169_v10 }
 0x105   : > { %3142 = vmatpush.bf16.msrb.mxu3 %v4531_v24  ;;  %v5079_v28 = vadd.f32 %v2766_v20, %v2748_v19  ;;  %v2732_v30 = vadd.f32 %v2731_v25, %v2713_v23  ;;  %3015 = vmatmul.bf16.gmra.mxu0 %v515_v50  ;;  %v266_v24 = vunpack.c.h.bf16 %v170_v34  ;;  %v329_v20 = vunpack.c.l.bf16 %v202_v9 }
 0x106   : > { %3082 = vmatpush.bf16.msrb.mxu0 %v4510_v48  ;;  %3034 = vmatmul.bf16.gmra.mxu1 %v516_v21  ;;  %v234_v48 = vunpack.c.h.bf16 %v154_v33  ;;  %v391_v53 = vmax.f32 %v263_v37, 0.0  ;;  %v392_v31 = vmax.f32 %v264_v14, 0.0  ;;  %v330_v23 = vunpack.c.h.bf16 %v202_v9 }
 0x107   : > { %3101 = vmatpush.bf16.msrb.mxu1 %v4518_v47  ;;  %3053 = vmatmul.bf16.gmra.mxu2 %v517_v22  ;;  %v394_v59 = vmax.f32 %v266_v24, 0.0  ;;  %v457_v33 = vmax.f32 %v329_v20, 0.0 }
 0x108   : > { %3120 = vmatpush.bf16.msrb.mxu2 %v4526_v42  ;;  %3072 = vmatmul.bf16.gmra.mxu3 %v518_v26  ;;  %v362_v57 = vmax.f32 %v234_v48, 0.0  ;;  %v487_v61 = vpack.c.bf16 %v391_v53, %v359_v52 }
 0x10a   : > { %3083 = vmatpush.bf16.msrb.mxu0 %v4509_v3  ;;  %v2750_v35 = vpop.f32.mrf.mxu2  ;;  %v2714_v42 = vpop.f32.mrf.mxu0  ;;  %v490_v5 = vpack.c.bf16 %v394_v59, %v362_v57 }
 0x10b   : > { %3102 = vmatpush.bf16.msrb.mxu1 %v4517_v1  ;;  %v2751_v40 = vadd.f32 %v2750_v35, %v2732_v30  ;;  %v2769_v41 = vpop.f32.mrf.mxu3  ;;  %v2715_v46 = vadd.f32 %v2714_v42, %v5047_v38  ;;  %v489_v38 = vpack.c.bf16 %v393_v56, %v361_v55  ;;  %v458_v35 = vmax.f32 %v330_v23, 0.0 }
 0x10c   : > { %3121 = vmatpush.bf16.msrb.mxu2 %v4525_v54  ;;  %v2733_v47 = vpop.f32.mrf.mxu1  ;;  %v360_v54 = vmax.f32 %v232_v39, 0.0 }
 0x10d   : > { %v2770_v49 = vadd.f32 %v2769_v41, %v2751_v40  ;;  %v2734_v51 = vadd.f32 %v2733_v47, %v2715_v46 }
 0x10e   : > { %3084 = vmatpush.bf16.msrb.mxu0 %v4508_v16  ;;  %v488_v1 = vpack.c.bf16 %v392_v31, %v360_v54 }
 0x10f   : > { %3103 = vmatpush.bf16.msrb.mxu1 %v4516_v15  ;;  %v296_v15 = vunpack.c.h.bf16 %v185_v8 }
 0x110   : > { %3122 = vmatpush.bf16.msrb.mxu2 %v4524_v7 }
 0x111   : > { %v424_v30 = vmax.f32 %v296_v15, 0.0 }
 0x112   : > { %3085 = vmatpush.bf16.msrb.mxu0 %v4507_v29  ;;  %v2752_v60 = vpop.f32.mrf.mxu2  ;;  %v2783_v0 = vpop.f32.mrf.mxu0  ;;  %v455_v29 = vmax.f32 %v327_v13, 0.0 }
 0x113   : > { %3104 = vmatpush.bf16.msrb.mxu1 %v4515_v27  ;;  %v2753_v62 = vadd.f32 %v2752_v60, %v2734_v51  ;;  %v2771_v63 = vpop.f32.mrf.mxu3  ;;  %v2784_v3 = vadd.f32 %v2783_v0, %v5070_v2  ;;  %v186_v2 = vld [vmem:[%s5138_s0 + $0x178] sm:$0xff]  ;;  %v423_v27 = vmax.f32 %v295_v12, 0.0 }
 0x114   : > { %3123 = vmatpush.bf16.msrb.mxu2 %v4523_v18  ;;  %v2802_v4 = vpop.f32.mrf.mxu1  ;;  %v328_v18 = vunpack.c.h.bf16 %v201_v43  ;;  %v297_v19 = vunpack.c.l.bf16 %v186_v2  ;;  %v298_v22 = vunpack.c.h.bf16 %v186_v2 }
 0x115   : > { %v2772_v6 = vadd.f32 %v2771_v63, %v2753_v62  ;;  %v2803_v7 = vadd.f32 %v2802_v4, %v2784_v3  ;;  %3086 = vmatmul.bf16.vlgmr.msrb.gmra.mxu0 %v487_v61  ;;  %v519_v37 = vpack.c.bf16 %v455_v29, %v423_v27 }
 0x116   : > { %3105 = vmatmul.bf16.vlgmr.msrb.gmra.mxu1 %v488_v1  ;;  %v456_v32 = vmax.f32 %v328_v18, 0.0  ;;  %v425_v10 = vmax.f32 %v297_v19, 0.0  ;;  %v426_v34 = vmax.f32 %v298_v22, 0.0 }
 0x117   : > { %3124 = vmatmul.bf16.vlgmr.msrb.gmra.mxu2 %v489_v38 }
 0x118   : > { %4277 = vmatmul.msk.bf16.vlgmr.msrb.gmra.mxu3 %vm2539_vm0, %v490_v5  ;;  %v520_v42 = vpack.c.bf16 %v456_v32, %v424_v30  ;;  %v522_v45 = vpack.c.bf16 %v458_v35, %v426_v34 }
 0x11a   : > { %v2821_v11 = vpop.f32.mrf.mxu2  ;;  %v2785_v50 = vpop.f32.mrf.mxu0 }
 0x11b   : > { %v2822_v16 = vadd.f32 %v2821_v11, %v2803_v7  ;;  %v2840_v17 = vpop.f32.mrf.mxu3  ;;  %v2786_v58 = vadd.f32 %v2785_v50, %v5079_v28  ;;  %v521_v28 = vpack.c.bf16 %v457_v33, %v425_v10 }
 0x11c   : > { %v2804_v21 = vpop.f32.mrf.mxu1 }
 0x11d   : > { %v2841_v25 = vadd.f32 %v2840_v17, %v2822_v16  ;;  %v2805_v26 = vadd.f32 %v2804_v21, %v2786_v58 }
 0x122   : > { %v2823_v36 = vpop.f32.mrf.mxu2  ;;  %v2788_v41 = vpop.f32.mrf.mxu0 }
 0x123   : > { %v2824_v39 = vadd.f32 %v2823_v36, %v2805_v26  ;;  %v2842_v40 = vpop.f32.mrf.mxu3  ;;  %v2789_v14 = vadd.f32 %v2788_v41, %v2770_v49 }
 0x124   : > { %v2807_v44 = vpop.f32.mrf.mxu1 }
 0x125   : > { %v2843_v46 = vadd.f32 %v2842_v40, %v2824_v39  ;;  %v2808_v47 = vadd.f32 %v2807_v44, %v2789_v14  ;;  %3091 = vmatmul.bf16.gmra.mxu0 %v519_v37 }
 0x126   : > { %3110 = vmatmul.bf16.gmra.mxu1 %v520_v42 }
 0x127   : > { %3129 = vmatmul.bf16.gmra.mxu2 %v521_v28 }
 0x128   : > { %4278 = vmatmul.msk.bf16.gmra.mxu3 %vm2539_vm0, %v522_v45 }
 0x12a   : > { %v2826_v48 = vpop.f32.mrf.mxu2  ;;  %v2790_v52 = vpop.f32.mrf.mxu0 }
 0x12b   : > { %v2827_v24 = vadd.f32 %v2826_v48, %v2808_v47  ;;  %v2845_v51 = vpop.f32.mrf.mxu3  ;;  %v2791_v53 = vadd.f32 %v2790_v52, %v2772_v6 }
 0x12c   : > { %v2809_v54 = vpop.f32.mrf.mxu1 }
 0x12d   : > { %v2846_v31 = vadd.f32 %v2845_v51, %v2827_v24  ;;  %v2810_v55 = vadd.f32 %v2809_v54, %v2791_v53 }
 0x132   : > { %v2828_v56 = vpop.f32.mrf.mxu2  ;;  %v2859_v59 = vpop.f32.mrf.mxu0 }
 0x133   : > { %v2829_v57 = vadd.f32 %v2828_v56, %v2810_v55  ;;  %v2847_v49 = vpop.f32.mrf.mxu3  ;;  %v2860_v60 = vadd.f32 %v2859_v59, %v2841_v25 }
 0x134   : > { %v2878_v61 = vpop.f32.mrf.mxu1 }
 0x135   : > { %v2848_v62 = vadd.f32 %v2847_v49, %v2829_v57  ;;  %v2879_v63 = vadd.f32 %v2878_v61, %v2860_v60 }
 0x13a   : > { %v2897_v0 = vpop.f32.mrf.mxu2  ;;  %v2861_v3 = vpop.f32.mrf.mxu0 }
 0x13b   : > { %v2898_v1 = vadd.f32 %v2897_v0, %v2879_v63  ;;  %v2916_v38 = vpop.f32.mrf.mxu3  ;;  %v2862_v4 = vadd.f32 %v2861_v3, %v2843_v46 }
 0x13c   : > { %v2880_v5 = vpop.f32.mrf.mxu1 }
 0x13d   : > { %v2917_v7 = vadd.f32 %v2916_v38, %v2898_v1  ;;  %v2881_v8 = vadd.f32 %v2880_v5, %v2862_v4 }
 0x142   : > { %v2899_v6 = vpop.f32.mrf.mxu2  ;;  %v2864_v9 = vpop.f32.mrf.mxu0 }
 0x143   : > { %v2900_v43 = vadd.f32 %v2899_v6, %v2881_v8  ;;  %v2918_v2 = vpop.f32.mrf.mxu3  ;;  %v2865_v11 = vadd.f32 %v2864_v9, %v2846_v31 }
 0x144   : > { %v2883_v12 = vpop.f32.mrf.mxu1 }
 0x145   : > { %v2919_v13 = vadd.f32 %v2918_v2, %v2900_v43  ;;  %v2884_v15 = vadd.f32 %v2883_v12, %v2865_v11 }
 0x14a   : > { %v2902_v16 = vpop.f32.mrf.mxu2  ;;  %v2866_v18 = vpop.f32.mrf.mxu0 }
 0x14b   : > { %v2903_v17 = vadd.f32 %v2902_v16, %v2884_v15  ;;  %v2921_v50 = vpop.f32.mrf.mxu3  ;;  %v2867_v19 = vadd.f32 %v2866_v18, %v2848_v62 }
 0x14c   : > { %v2885_v20 = vpop.f32.mrf.mxu1 }
 0x14d   : > { %v2922_v58 = vadd.f32 %v2921_v50, %v2903_v17  ;;  %v2886_v21 = vadd.f32 %v2885_v20, %v2867_v19 }
 0x152   : > { %v2904_v22 = vpop.f32.mrf.mxu2  ;;  %v2935_v26 = vpop.f32.mrf.mxu0 }
 0x153   : > { %v2905_v23 = vadd.f32 %v2904_v22, %v2886_v21  ;;  %v2923_v25 = vpop.f32.mrf.mxu3  ;;  %v2936_v51 = vadd.f32 %v2935_v26, %v2917_v7 }
 0x154   : > { %v2954_v27 = vpop.f32.mrf.mxu1 }
 0x155   : > { %v2924_v29 = vadd.f32 %v2923_v25, %v2905_v23  ;;  %v2955_v52 = vadd.f32 %v2954_v27, %v2936_v51 }
 0x15a   : > { %v2973_v30 = vpop.f32.mrf.mxu2  ;;  %v2937_v10 = vpop.f32.mrf.mxu0 }
 0x15b   : > { %v2992_v32 = vpop.f32.mrf.mxu3  ;;  %v2974_v54 = vadd.f32 %v2973_v30, %v2955_v52  ;;  %v2938_v57 = vadd.f32 %v2937_v10, %v2919_v13 }
 0x15c   : > { %v2956_v33 = vpop.f32.mrf.mxu1 }
 0x15d   : > { %v2993_v49 = vadd.f32 %v2992_v32, %v2974_v54  ;;  %v2957_v59 = vadd.f32 %v2956_v33, %v2938_v57 }
 0x162   : > { %v2975_v34 = vpop.f32.mrf.mxu2  ;;  %v2940_v36 = vpop.f32.mrf.mxu0 }
 0x163   : > { %v2994_v35 = vpop.f32.mrf.mxu3  ;;  %v2976_v62 = vadd.f32 %v2975_v34, %v2957_v59  ;;  %v2941_v38 = vadd.f32 %v2940_v36, %v2922_v58 }
 0x164   : > { %v2959_v37 = vpop.f32.mrf.mxu1 }
 0x165   : > { %v2995_v4 = vadd.f32 %v2994_v35, %v2976_v62  ;;  %v2960_v7 = vadd.f32 %v2959_v37, %v2941_v38 }
 0x16a   : > { %v2978_v39 = vpop.f32.mrf.mxu2  ;;  %v2942_v41 = vpop.f32.mrf.mxu0 }
 0x16b   : > { %v2997_v40 = vpop.f32.mrf.mxu3  ;;  %v2979_v43 = vadd.f32 %v2978_v39, %v2960_v7  ;;  %v2943_v13 = vadd.f32 %v2942_v41, %v2924_v29 }
 0x16c   : > { %v2961_v42 = vpop.f32.mrf.mxu1 }
 0x16d   : > { %v2998_v17 = vadd.f32 %v2997_v40, %v2979_v43  ;;  %v2962_v18 = vadd.f32 %v2961_v42, %v2943_v13 }
 0x172   : > { %v2980_v28 = vpop.f32.mrf.mxu2  ;;  %v3011_v44 = vpop.f32.mrf.mxu0 }
 0x173   : > { %v2999_v14 = vpop.f32.mrf.mxu3  ;;  %v3012_v60 = vadd.f32 %v3011_v44, %v2993_v49  ;;  %v2981_v21 = vadd.f32 %v2980_v28, %v2962_v18 }
 0x174   : > { %v3030_v45 = vpop.f32.mrf.mxu1 }
 0x175   : > { %v3031_v3 = vadd.f32 %v3030_v45, %v3012_v60  ;;  %v3000_v29 = vadd.f32 %v2999_v14, %v2981_v21 }
 0x17a   : > { %v3049_v46 = vpop.f32.mrf.mxu2  ;;  %v3013_v48 = vpop.f32.mrf.mxu0 }
 0x17b   : > { %v3068_v47 = vpop.f32.mrf.mxu3  ;;  %v3050_v5 = vadd.f32 %v3049_v46, %v3031_v3  ;;  %v3014_v8 = vadd.f32 %v3013_v48, %v2995_v4 }
 0x17c   : > { %v3032_v24 = vpop.f32.mrf.mxu1 }
 0x17d   : > { %v3069_v2 = vadd.f32 %v3068_v47, %v3050_v5  ;;  %v3033_v15 = vadd.f32 %v3032_v24, %v3014_v8 }
 0x182   : > { %v3051_v53 = vpop.f32.mrf.mxu2  ;;  %v3016_v55 = vpop.f32.mrf.mxu0 }
 0x183   : > { %v3070_v31 = vpop.f32.mrf.mxu3  ;;  %v3052_v50 = vadd.f32 %v3051_v53, %v3033_v15  ;;  %v3017_v19 = vadd.f32 %v3016_v55, %v2998_v17 }
 0x184   : > { %v3035_v56 = vpop.f32.mrf.mxu1 }
 0x185   : > { %v3071_v22 = vadd.f32 %v3070_v31, %v3052_v50  ;;  %v3036_v30 = vadd.f32 %v3035_v56, %v3017_v19 }
 0x18a   : > { %v3054_v61 = vpop.f32.mrf.mxu2  ;;  %v3018_v0 = vpop.f32.mrf.mxu0 }
 0x18b   : > { %v3073_v63 = vpop.f32.mrf.mxu3  ;;  %v3055_v33 = vadd.f32 %v3054_v61, %v3036_v30  ;;  %v3019_v34 = vadd.f32 %v3018_v0, %v3000_v29 }
 0x18c   : > { %v3037_v1 = vpop.f32.mrf.mxu1 }
 0x18d   : > { %v3074_v37 = vadd.f32 %v3073_v63, %v3055_v33  ;;  %v3038_v42 = vadd.f32 %v3037_v1, %v3019_v34 }
 0x192   : > { %v3056_v6 = vpop.f32.mrf.mxu2  ;;  %v3087_v11 = vpop.f32.mrf.mxu0 }
 0x193   : > { %v3075_v9 = vpop.f32.mrf.mxu3  ;;  %v3088_v16 = vadd.f32 %v3087_v11, %v3069_v2  ;;  %v3057_v46 = vadd.f32 %v3056_v6, %v3038_v42 }
 0x194   : > { %v3106_v12 = vpop.f32.mrf.mxu1 }
 0x195   : > { %v3107_v20 = vadd.f32 %v3106_v12, %v3088_v16  ;;  %v3076_v48 = vadd.f32 %v3075_v9, %v3057_v46 }
 0x19a   : > { %v3125_v58 = vpop.f32.mrf.mxu2  ;;  %v3089_v26 = vpop.f32.mrf.mxu0 }
 0x19b   : > { %v3126_v23 = vadd.f32 %v3125_v58, %v3107_v20  ;;  %v3144_v25 = vpop.f32.mrf.mxu3  ;;  %v3090_v10 = vadd.f32 %v3089_v26, %v3071_v22 }
 0x19c   : > { %v3108_v27 = vpop.f32.mrf.mxu1 }
 0x19d   : > { %v3145_v32 = vadd.f32 %v3144_v25, %v3126_v23  ;;  %v3109_v35 = vadd.f32 %v3108_v27, %v3090_v10 }
 0x19f   : > { %3154 = vst [vmem:[%s5112_s26] sm:$0xff] %v3145_v32 }
 0x1a2   : > { %v3127_v36 = vpop.f32.mrf.mxu2  ;;  %v3092_v41 = vpop.f32.mrf.mxu0 }
 0x1a3   : > { %v3128_v39 = vadd.f32 %v3127_v36, %v3109_v35  ;;  %v3146_v40 = vpop.f32.mrf.mxu3  ;;  %v3093_v44 = vadd.f32 %v3092_v41, %v3074_v37 }
 0x1a4   : > { %v3111_v45 = vpop.f32.mrf.mxu1 }
 0x1a5   : > { %v3147_v28 = vadd.f32 %v3146_v40, %v3128_v39  ;;  %v3112_v14 = vadd.f32 %v3111_v45, %v3093_v44 }
 0x1a6   : > { %v3201_v60 = vld [vmem:[%s5112_s26] sm:$0xff] (%p4624_p4) }
 0x1a7   : > { %3155 = vst [vmem:[%s5112_s26 + $0x8] sm:$0xff] %v3147_v28 }
 0x1a8   : > { %3202 = vst [vmem:[%s3166_s29] sm:$0xff] (%p4624_p4), %v3201_v60 }
 0x1aa   : > { %v3130_v47 = vpop.f32.mrf.mxu2  ;;  %v3094_v52 = vpop.f32.mrf.mxu0 }
 0x1ab   : > { %v3131_v24 = vadd.f32 %v3130_v47, %v3112_v14  ;;  %v3149_v51 = vpop.f32.mrf.mxu3  ;;  %v3095_v54 = vadd.f32 %v3094_v52, %v3076_v48 }
 0x1ac   : > { %v3113_v31 = vpop.f32.mrf.mxu1 }
 0x1ad   : > { %v3150_v53 = vadd.f32 %v3149_v51, %v3131_v24  ;;  %v3114_v55 = vadd.f32 %v3113_v31, %v3095_v54 }
 0x1ae   : > { %v3203_v61 = vld [vmem:[%s5112_s26 + $0x8] sm:$0xff] (%p4624_p4) }
 0x1af   : > { %3156 = vst [vmem:[%s5112_s26 + $0x10] sm:$0xff] %v3150_v53 }
 0x1b0   : > { %3204 = vst [vmem:[%s3166_s29 + $0x18] sm:$0xff] (%p4624_p4), %v3203_v61 }
 0x1b2   : > { %v3132_v56 = vpop.f32.mrf.mxu2 }
 0x1b3   : > { %v3133_v57 = vadd.f32 %v3132_v56, %v3114_v55  ;;  %v3151_v49 = vpop.f32.mrf.mxu3  ;;  %3164 = sbr.rel (!%p4624_p4) target bundleno = 448 (0x1c0), region = 32 }
 0x1b5   : > { %v3152_v59 = vadd.f32 %v3151_v49, %v3133_v57 }
 0x1b6   : > { %v3205_v62 = vld [vmem:[%s5112_s26 + $0x10] sm:$0xff] (%p4624_p4) }
 0x1b7   : > { %3157 = vst [vmem:[%s5112_s26 + $0x18] sm:$0x1] %v3152_v59 }
 0x1b8   : > { %3206 = vst [vmem:[%s3166_s29 + $0x30] sm:$0xff] %v3205_v62 }
 0x1be   : > { %v3207_v63 = vld [vmem:[%s5112_s26 + $0x18] sm:$0xff] }
 0x1bf   : > { %3208 = vst [vmem:[%s3166_s29 + $0x48] sm:$0xff] %v3207_v63 }
 0x1c0 PF: > { %p9_p8 = scmp.ge.s32.totalorder %s4614_s13, 5   ;;  %s5142_s9 = smov %s4578_s10 }
 0x1c1   : > { %s5143_s10 = smov %s4622_s16  ;;  %s5144_s11 = smov %s4614_s13 }
 0x1c2   :  { %11 = sbr.rel (!%p9_p8) target bundleno = 2 (0x2), region = 96 }

</bundles_post_ra>
